<compile_context>
chip_gen: v7x
topology: tpu7x:2x2x1
jax: 0.10.0
libtpu: 0.0.40
codegen_flags: <defaults>
</compile_context>

<pallas_src>
import functools

import jax
import jax.numpy as jnp
import numpy as np
from jax.experimental import pallas as pl
from jax.experimental.pallas import tpu as pltpu


def _round_up(x, m):
    return ((x + m - 1) // m) * m


# ------------------------------ fused kernel -------------------------------

def _bottleneck_kernel(xph_ref, m_ref, w1_ref, b1_ref, w2_ref, b2_ref,
                       w3_ref, b3_ref, xsc_ref, *rest,
                       stride, Wp, T, Thalo, has_proj):
    if has_proj:
        ws_ref, bs_ref, o_ref = rest
    else:
        (o_ref,) = rest
    s = stride

    j = pl.program_id(1)
    row0 = pl.multiple_of(j * T, 8)            # T is a multiple of 8

    # ---- stage 1: 1x1 conv + folded BN1 + ReLU, per spatial phase ----------
    # m_ref is the zero-padding mask, so y1[pq] is exactly the zero-padded
    # conv1 activation of phase pq over the halo'd row window of this tile.
    b1 = b1_ref[...]                           # hoist broadcast out of loop
    y1 = []
    for pq in range(s * s):
        x_loc = xph_ref[pq, pl.ds(row0, Thalo), :]
        m_loc = m_ref[pq, pl.ds(row0, Thalo), :]
        a = jnp.dot(x_loc, w1_ref[...], preferred_element_type=jnp.float32)
        # mask + bf16 cast applied exactly once here
        y1.append((jnp.maximum(a + b1, 0.0) * m_loc).astype(jnp.bfloat16))

    # ---- stage 2: 3x3 conv (stride s) + folded BN2 + ReLU -------------------
    #   out(i, j) = sum_{kh,kw} y1pad[s*i + kh, s*j + kw] @ W2[kh, kw]
    # In local phase coordinates tap (kh, kw) is the slice of phase
    # (kh % s, kw % s) starting at (kh//s)*Wp + (kw//s).  Column-shifted
    # copies keep all 9 tap slices 8-aligned (Wp % 8 == 0, T % 8 == 0).
    max_oh = 2 // s
    shifted = {}
    taps = []
    for kh in range(3):
        ph, oh = kh % s, kh // s
        for kw in range(3):
            pw, ow = kw % s, kw // s
            pq = ph * s + pw
            if ow == 0:
                taps.append(jax.lax.slice_in_dim(y1[pq], oh * Wp, oh * Wp + T))
            else:
                key = (pq, ow)
                if key not in shifted:
                    shifted[key] = jax.lax.slice_in_dim(
                        y1[pq], ow, ow + max_oh * Wp + T)
                taps.append(jax.lax.slice_in_dim(
                    shifted[key], oh * Wp, oh * Wp + T))

    # Two partial accumulators, each initialized from its first dot.
    acc_a = jnp.dot(taps[0], w2_ref[0], preferred_element_type=jnp.float32)
    acc_b = jnp.dot(taps[1], w2_ref[1], preferred_element_type=jnp.float32)
    for t in range(2, 9):
        part = jnp.dot(taps[t], w2_ref[t], preferred_element_type=jnp.float32)
        if t % 2 == 0:
            acc_a = acc_a + part
        else:
            acc_b = acc_b + part
    y2 = jnp.maximum((acc_a + acc_b) + b2_ref[...], 0.0).astype(jnp.bfloat16)

    # ---- stage 3: 1x1 conv + folded BN3 -------------------------------------
    y3 = jnp.dot(y2, w3_ref[...],
                 preferred_element_type=jnp.float32) + b3_ref[...]

    # ---- shortcut -----------------------------------------------------------
    if has_proj:
        sc = jnp.dot(xsc_ref[0], ws_ref[...],
                     preferred_element_type=jnp.float32) + bs_ref[...]
    else:
        sc = xsc_ref[0]                         # identity path, f32 input

    o_ref[0] = jnp.maximum(y3 + sc, 0.0).astype(o_ref.dtype)


# ------------------------------- glue code ---------------------------------

def _fold_conv_bn(w_oihw, bn, eps=1e-5):
    """Fold inference BatchNorm into an OIHW conv weight -> (taps, in, out)."""
    gamma, beta, mean, var = bn
    scale = gamma / jnp.sqrt(var + eps)
    bias = beta - mean * scale
    o, i, kh, kw = w_oihw.shape
    wm = jnp.transpose(w_oihw, (2, 3, 1, 0)).reshape(kh * kw, i, o)
    wm = wm * scale[None, None, :]
    return wm.astype(jnp.bfloat16), bias.reshape(1, o).astype(jnp.float32)


@functools.partial(jax.jit, static_argnames=("stride", "row_tile"))
def bottleneck_forward(x_nchw, params, stride, *, row_tile=256):
    """Fused Pallas forward pass.  Input/output are NCHW f32 (PyTorch parity)."""
    s = int(stride)
    assert s in (1, 2), "ResNet Bottleneck uses stride 1 or 2"
    x = jnp.transpose(x_nchw, (0, 2, 3, 1))                 # -> NHWC
    n, H, W, cin = x.shape
    cout = params['conv1_w'].shape[0]
    cexp = params['conv3_w'].shape[0]
    has_proj = 'sc_w' in params

    # Halo pad of 1 (conv2's padding=1) plus alignment pad so every phase has
    # the same extent and Wp is a multiple of 8 (sublane-aligned tap slices).
    pad_h = (-(H + 2)) % s
    pad_w = (-(W + 2)) % (8 * s)
    xp = jnp.pad(x, ((0, 0), (1, 1 + pad_h), (1, 1 + pad_w), (0, 0)))
    Hp = (H + 2 + pad_h) // s
    Wp = (W + 2 + pad_w) // s
    Ho = (H - 1) // s + 1
    Wo = (W - 1) // s + 1

    dmax = (2 // s) * (Wp + 1)          # conv2 tap halo in flat phase rows
    L2 = Hp * Wp - dmax                 # flat rows containing all valid outputs

    # Row tiling of the flat output.  L2p >= Ho*Wp so the output reshape to
    # (Ho, Wp) needs no post-kernel padding.
    need = max(L2, Ho * Wp)
    T = _round_up(min(row_tile, _round_up(need, 8)), 8)
    num_tiles = -(-need // T)
    L2p = num_tiles * T
    Thalo = _round_up(T + dmax, 8)      # conv1 rows computed per tile
    Pflat = L2p - T + Thalo             # rows each phase slab must provide

    # Space-to-depth phase split:  phase(p, q)[u, v] = xpad[s*u + p, s*v + q].
    phases = [xp[:, p::s, q::s, :].reshape(n, Hp * Wp, cin)
              for p in range(s) for q in range(s)]
    xph = jnp.stack(phases, axis=1)                          # (n, s*s, Hp*Wp, cin)
    xph = jnp.pad(xph, ((0, 0), (0, 0), (0, Pflat - Hp * Wp), (0, 0)))
    xph = xph.reshape(n * s * s, Pflat, cin).astype(jnp.bfloat16)

    # Zero-padding mask for conv1 output (halo + alignment pad -> 0).
    masks = np.zeros((s * s, Pflat, 1), np.float32)
    for p in range(s):
        for q in range(s):
            r = s * np.arange(Hp)[:, None] + p
            c = s * np.arange(Wp)[None, :] + q
            m = (r >= 1) & (r <= H) & (c >= 1) & (c <= W)
            masks[p * s + q, :Hp * Wp, 0] = m.astype(np.float32).reshape(-1)
    masks = jnp.asarray(masks)

    # Shortcut source:  sc(u, v) = x[s*u, s*v] = xpad[s*u + 1, s*v + 1].
    p_sc, q_sc = 1 % s, 1 % s
    d_sc = (1 // s) * (Wp + 1)
    sc_flat = xp[:, p_sc::s, q_sc::s, :].reshape(n, Hp * Wp, cin)
    sc_flat = jnp.pad(sc_flat,
                      ((0, 0), (0, max(0, d_sc + L2p - Hp * Wp)), (0, 0)))
    sc_src = sc_flat[:, d_sc:d_sc + L2p, :]
    xsc = sc_src.astype(jnp.bfloat16) if has_proj else sc_src  # identity: f32

    w1f, b1 = _fold_conv_bn(params['conv1_w'], params['bn1'])
    w2f, b2 = _fold_conv_bn(params['conv2_w'], params['bn2'])
    w3f, b3 = _fold_conv_bn(params['conv3_w'], params['bn3'])

    args = [xph, masks, w1f[0], b1, w2f, b2, w3f[0], b3, xsc]
    in_specs = [
        pl.BlockSpec((s * s, Pflat, cin), lambda i, j: (i, 0, 0)),
        pl.BlockSpec((s * s, Pflat, 1), lambda i, j: (0, 0, 0)),
        pl.BlockSpec((cin, cout), lambda i, j: (0, 0)),
        pl.BlockSpec((1, cout), lambda i, j: (0, 0)),
        pl.BlockSpec((9, cout, cout), lambda i, j: (0, 0, 0)),
        pl.BlockSpec((1, cout), lambda i, j: (0, 0)),
        pl.BlockSpec((cout, cexp), lambda i, j: (0, 0)),
        pl.BlockSpec((1, cexp), lambda i, j: (0, 0)),
        pl.BlockSpec((1, T, xsc.shape[-1]), lambda i, j: (i, j, 0)),
    ]
    if has_proj:
        wsf, bs = _fold_conv_bn(params['sc_w'], params['sc_bn'])
        args += [wsf[0], bs]
        in_specs += [pl.BlockSpec((cin, cexp), lambda i, j: (0, 0)),
                     pl.BlockSpec((1, cexp), lambda i, j: (0, 0))]

    kernel = functools.partial(_bottleneck_kernel, stride=s, Wp=Wp, T=T,
                               Thalo=Thalo, has_proj=has_proj)
    out_flat = pl.pallas_call(
        kernel,
        out_shape=jax.ShapeDtypeStruct((n, L2p, cexp), jnp.bfloat16),
        grid=(n, num_tiles),
        in_specs=in_specs,
        out_specs=pl.BlockSpec((1, T, cexp), lambda i, j: (i, j, 0)),
        compiler_params=pltpu.CompilerParams(
            dimension_semantics=("parallel", "parallel"),
            vmem_limit_bytes=48 * 1024 * 1024),
    )(*args)

    # Crop the flat phase grid to (Ho, Wo) and restore NCHW / f32 (one fused
    # pass under jit; the f32 cast rides along with the transpose).
    out = out_flat[:, :Ho * Wp, :].reshape(n, Ho, Wp, cexp)[:, :, :Wo, :]
    return jnp.transpose(out, (0, 3, 1, 2)).astype(jnp.float32)


# ---------------------- pure-JAX reference (for check) ----------------------

def reference_forward(x_nchw, params, stride):
    def conv(x, w, strides, padding):
        return jax.lax.conv_general_dilated(
            x, w, window_strides=strides, padding=padding,
            dimension_numbers=('NCHW', 'OIHW', 'NCHW'))

    def bn(x, p):
        gamma, beta, mean, var = p
        inv = 1.0 / jnp.sqrt(var + 1e-5)
        return ((x - mean[None, :, None, None]) * (gamma * inv)[None, :, None, None]
                + beta[None, :, None, None])

    out = jax.nn.relu(bn(conv(x_nchw, params['conv1_w'], (1, 1), 'VALID'),
                         params['bn1']))
    out = jax.nn.relu(bn(conv(out, params['conv2_w'], (stride, stride),
                              ((1, 1), (1, 1))), params['bn2']))
    out = bn(conv(out, params['conv3_w'], (1, 1), 'VALID'), params['bn3'])
    sc = x_nchw
    if 'sc_w' in params:
        sc = bn(conv(x_nchw, params['sc_w'], (stride, stride), 'VALID'),
                params['sc_bn'])
    return jax.nn.relu(out + sc)


# ---------------------------------- main ------------------------------------

if __name__ == "__main__":
    def bn_params(k, c):
        k1, k2, k3, k4 = jax.random.split(k, 4)
        gamma = jax.random.uniform(k1, (c,), jnp.float32, 0.5, 1.5)
        beta = jax.random.normal(k2, (c,), jnp.float32) * 0.1
        mean = jax.random.normal(k3, (c,), jnp.float32) * 0.1
        var = jax.random.uniform(k4, (c,), jnp.float32, 0.5, 1.5)
        return (gamma, beta, mean, var)

    def make_params(key, cin, cout, stride):
        cexp = cout * 4
        keys = jax.random.split(key, 9)
        params = {
            'conv1_w': jax.random.normal(keys[0], (cout, cin, 1, 1),
                                         jnp.float32) * 0.1,
            'bn1': bn_params(keys[1], cout),
            'conv2_w': jax.random.normal(keys[2], (cout, cout, 3, 3),
                                         jnp.float32) * 0.1,
            'bn2': bn_params(keys[3], cout),
            'conv3_w': jax.random.normal(keys[4], (cexp, cout, 1, 1),
                                         jnp.float32) * 0.1,
            'bn3': bn_params(keys[5], cexp),
        }
        if stride != 1 or cin != cexp:
            params['sc_w'] = jax.random.normal(keys[6], (cexp, cin, 1, 1),
                                               jnp.float32) * 0.1
            params['sc_bn'] = bn_params(keys[7], cexp)
        return params, keys[8]

    key = jax.random.PRNGKey(0)
    # cexp = 4*cout = 128 keeps the output lane-dense (per perf review).
    configs = [
        # (in_channels, out_channels, stride, n, h, w, row_tile)
        (64, 32, 2, 2, 16, 16, 64),    # projection shortcut, stride 2, 2 row tiles
        (128, 32, 1, 2, 16, 16, 256),  # identity shortcut (f32 residual), stride 1
        (64, 32, 1, 2, 16, 16, 128),   # projection shortcut (channel change), stride 1
    ]
    for cin, cout, stride, n, h, w, rt in configs:
        key, sub = jax.random.split(key)
        params, xkey = make_params(sub, cin, cout, stride)
        x = jax.random.normal(xkey, (n, cin, h, w), jnp.float32)

        out = jax.block_until_ready(
            bottleneck_forward(x, params, stride=stride, row_tile=rt))
        ref = reference_forward(x, params, stride)
        # bf16 matmul inputs / bf16 output with f32 accumulation -> relaxed tol.
        np.testing.assert_allclose(np.asarray(out), np.asarray(ref),
                                   atol=5e-2, rtol=5e-2)

    print("KERNEL_OK")
</pallas_src>

<mosaic_0001>
module attributes {stable_mosaic.version = 11 : i64} {
  func.func @_bottleneck_kernel(%arg0: i32, %arg1: i32, %arg2: memref<4x152x64xbf16, #tpu.memory_space<vmem>>, %arg3: memref<4x152x1xf32, #tpu.memory_space<vmem>>, %arg4: memref<64x32xbf16, #tpu.memory_space<vmem>>, %arg5: memref<1x32xf32, #tpu.memory_space<vmem>>, %arg6: memref<9x32x32xbf16, #tpu.memory_space<vmem>>, %arg7: memref<1x32xf32, #tpu.memory_space<vmem>>, %arg8: memref<32x128xbf16, #tpu.memory_space<vmem>>, %arg9: memref<1x128xf32, #tpu.memory_space<vmem>>, %arg10: memref<1x64x64xbf16, #tpu.memory_space<vmem>>, %arg11: memref<64x128xbf16, #tpu.memory_space<vmem>>, %arg12: memref<1x128xf32, #tpu.memory_space<vmem>>, %arg13: memref<1x64x128xbf16, #tpu.memory_space<vmem>>) attributes {dimension_semantics = [#tpu.dimension_semantics<parallel>, #tpu.dimension_semantics<parallel>], iteration_bounds = array<i64: 2, 2>, scalar_prefetch = 0 : i64, scratch_operands = 0 : i64, tpu.core_type = #tpu.core_type<tc>, window_params = [{transform_indices = @transform_0, window_bounds = array<i64: 4, 152, 64>}, {pipeline_mode = #tpu.pipeline_mode<synchronous>, transform_indices = @transform_1, window_bounds = array<i64: 4, 152, 1>}, {pipeline_mode = #tpu.pipeline_mode<synchronous>, transform_indices = @transform_2, window_bounds = array<i64: 64, 32>}, {pipeline_mode = #tpu.pipeline_mode<synchronous>, transform_indices = @transform_3, window_bounds = array<i64: 1, 32>}, {pipeline_mode = #tpu.pipeline_mode<synchronous>, transform_indices = @transform_4, window_bounds = array<i64: 9, 32, 32>}, {pipeline_mode = #tpu.pipeline_mode<synchronous>, transform_indices = @transform_5, window_bounds = array<i64: 1, 32>}, {pipeline_mode = #tpu.pipeline_mode<synchronous>, transform_indices = @transform_6, window_bounds = array<i64: 32, 128>}, {pipeline_mode = #tpu.pipeline_mode<synchronous>, transform_indices = @transform_7, window_bounds = array<i64: 1, 128>}, {transform_indices = @transform_8, window_bounds = array<i64: 1, 64, 64>}, {pipeline_mode = #tpu.pipeline_mode<synchronous>, transform_indices = @transform_9, window_bounds = array<i64: 64, 128>}, {pipeline_mode = #tpu.pipeline_mode<synchronous>, transform_indices = @transform_10, window_bounds = array<i64: 1, 128>}, {transform_indices = @transform_11, window_bounds = array<i64: 1, 64, 128>}]} {
    %c64_i32 = arith.constant 64 : i32
    %0 = arith.muli %arg1, %c64_i32 : i32
    %1 = tpu.assume_multiple %0, 8 : i32
    %c0 = arith.constant 0 : index
    %c0_0 = arith.constant 0 : index
    %2 = vector.load %arg5[%c0, %c0_0] : memref<1x32xf32, #tpu.memory_space<vmem>>, vector<1x32xf32>
    %c0_1 = arith.constant 0 : index
    %3 = arith.index_cast %1 : i32 to index
    %c0_2 = arith.constant 0 : index
    %4 = vector.load %arg2[%c0_1, %3, %c0_2] : memref<4x152x64xbf16, #tpu.memory_space<vmem>>, vector<1x88x64xbf16>
    %5 = vector.shape_cast %4 : vector<1x88x64xbf16> to vector<88x64xbf16>
    %c0_3 = arith.constant 0 : index
    %6 = arith.index_cast %1 : i32 to index
    %c0_4 = arith.constant 0 : index
    %7 = vector.load %arg3[%c0_3, %6, %c0_4] : memref<4x152x1xf32, #tpu.memory_space<vmem>>, vector<1x88x1xf32>
    %8 = vector.shape_cast %7 : vector<1x88x1xf32> to vector<88x1xf32>
    %c0_5 = arith.constant 0 : index
    %c0_6 = arith.constant 0 : index
    %9 = vector.load %arg4[%c0_5, %c0_6] : memref<64x32xbf16, #tpu.memory_space<vmem>>, vector<64x32xbf16>
    %cst = arith.constant dense<0.000000e+00> : vector<88x32xf32>
    %10 = tpu.matmul %5, %9, %cst {dimension_numbers = #tpu.dot_dimension_numbers<[1], [0], [0], [1], [0, 0, 1, 1], [], []>} : vector<88x64xbf16>, vector<64x32xbf16>, vector<88x32xf32> -> vector<88x32xf32>
    %11 = vector.broadcast %2 : vector<1x32xf32> to vector<88x32xf32>
    %12 = arith.addf %10, %11 : vector<88x32xf32>
    %cst_7 = arith.constant 0.000000e+00 : f32
    %13 = vector.broadcast %cst_7 : f32 to vector<88x32xf32>
    %14 = arith.maximumf %12, %13 : vector<88x32xf32>
    %15 = vector.broadcast %8 : vector<88x1xf32> to vector<88x32xf32>
    %16 = arith.mulf %14, %15 : vector<88x32xf32>
    %17 = arith.truncf %16 : vector<88x32xf32> to vector<88x32xbf16>
    %c1 = arith.constant 1 : index
    %18 = arith.index_cast %1 : i32 to index
    %c0_8 = arith.constant 0 : index
    %19 = vector.load %arg2[%c1, %18, %c0_8] : memref<4x152x64xbf16, #tpu.memory_space<vmem>>, vector<1x88x64xbf16>
    %20 = vector.shape_cast %19 : vector<1x88x64xbf16> to vector<88x64xbf16>
    %c1_9 = arith.constant 1 : index
    %21 = arith.index_cast %1 : i32 to index
    %c0_10 = arith.constant 0 : index
    %22 = vector.load %arg3[%c1_9, %21, %c0_10] : memref<4x152x1xf32, #tpu.memory_space<vmem>>, vector<1x88x1xf32>
    %23 = vector.shape_cast %22 : vector<1x88x1xf32> to vector<88x1xf32>
    %c0_11 = arith.constant 0 : index
    %c0_12 = arith.constant 0 : index
    %24 = vector.load %arg4[%c0_11, %c0_12] : memref<64x32xbf16, #tpu.memory_space<vmem>>, vector<64x32xbf16>
    %cst_13 = arith.constant dense<0.000000e+00> : vector<88x32xf32>
    %25 = tpu.matmul %20, %24, %cst_13 {dimension_numbers = #tpu.dot_dimension_numbers<[1], [0], [0], [1], [0, 0, 1, 1], [], []>} : vector<88x64xbf16>, vector<64x32xbf16>, vector<88x32xf32> -> vector<88x32xf32>
    %26 = vector.broadcast %2 : vector<1x32xf32> to vector<88x32xf32>
    %27 = arith.addf %25, %26 : vector<88x32xf32>
    %cst_14 = arith.constant 0.000000e+00 : f32
    %28 = vector.broadcast %cst_14 : f32 to vector<88x32xf32>
    %29 = arith.maximumf %27, %28 : vector<88x32xf32>
    %30 = vector.broadcast %23 : vector<88x1xf32> to vector<88x32xf32>
    %31 = arith.mulf %29, %30 : vector<88x32xf32>
    %32 = arith.truncf %31 : vector<88x32xf32> to vector<88x32xbf16>
    %c2 = arith.constant 2 : index
    %33 = arith.index_cast %1 : i32 to index
    %c0_15 = arith.constant 0 : index
    %34 = vector.load %arg2[%c2, %33, %c0_15] : memref<4x152x64xbf16, #tpu.memory_space<vmem>>, vector<1x88x64xbf16>
    %35 = vector.shape_cast %34 : vector<1x88x64xbf16> to vector<88x64xbf16>
    %c2_16 = arith.constant 2 : index
    %36 = arith.index_cast %1 : i32 to index
    %c0_17 = arith.constant 0 : index
    %37 = vector.load %arg3[%c2_16, %36, %c0_17] : memref<4x152x1xf32, #tpu.memory_space<vmem>>, vector<1x88x1xf32>
    %38 = vector.shape_cast %37 : vector<1x88x1xf32> to vector<88x1xf32>
    %c0_18 = arith.constant 0 : index
    %c0_19 = arith.constant 0 : index
    %39 = vector.load %arg4[%c0_18, %c0_19] : memref<64x32xbf16, #tpu.memory_space<vmem>>, vector<64x32xbf16>
    %cst_20 = arith.constant dense<0.000000e+00> : vector<88x32xf32>
    %40 = tpu.matmul %35, %39, %cst_20 {dimension_numbers = #tpu.dot_dimension_numbers<[1], [0], [0], [1], [0, 0, 1, 1], [], []>} : vector<88x64xbf16>, vector<64x32xbf16>, vector<88x32xf32> -> vector<88x32xf32>
    %41 = vector.broadcast %2 : vector<1x32xf32> to vector<88x32xf32>
    %42 = arith.addf %40, %41 : vector<88x32xf32>
    %cst_21 = arith.constant 0.000000e+00 : f32
    %43 = vector.broadcast %cst_21 : f32 to vector<88x32xf32>
    %44 = arith.maximumf %42, %43 : vector<88x32xf32>
    %45 = vector.broadcast %38 : vector<88x1xf32> to vector<88x32xf32>
    %46 = arith.mulf %44, %45 : vector<88x32xf32>
    %47 = arith.truncf %46 : vector<88x32xf32> to vector<88x32xbf16>
    %c3 = arith.constant 3 : index
    %48 = arith.index_cast %1 : i32 to index
    %c0_22 = arith.constant 0 : index
    %49 = vector.load %arg2[%c3, %48, %c0_22] : memref<4x152x64xbf16, #tpu.memory_space<vmem>>, vector<1x88x64xbf16>
    %50 = vector.shape_cast %49 : vector<1x88x64xbf16> to vector<88x64xbf16>
    %c3_23 = arith.constant 3 : index
    %51 = arith.index_cast %1 : i32 to index
    %c0_24 = arith.constant 0 : index
    %52 = vector.load %arg3[%c3_23, %51, %c0_24] : memref<4x152x1xf32, #tpu.memory_space<vmem>>, vector<1x88x1xf32>
    %53 = vector.shape_cast %52 : vector<1x88x1xf32> to vector<88x1xf32>
    %c0_25 = arith.constant 0 : index
    %c0_26 = arith.constant 0 : index
    %54 = vector.load %arg4[%c0_25, %c0_26] : memref<64x32xbf16, #tpu.memory_space<vmem>>, vector<64x32xbf16>
    %cst_27 = arith.constant dense<0.000000e+00> : vector<88x32xf32>
    %55 = tpu.matmul %50, %54, %cst_27 {dimension_numbers = #tpu.dot_dimension_numbers<[1], [0], [0], [1], [0, 0, 1, 1], [], []>} : vector<88x64xbf16>, vector<64x32xbf16>, vector<88x32xf32> -> vector<88x32xf32>
    %56 = vector.broadcast %2 : vector<1x32xf32> to vector<88x32xf32>
    %57 = arith.addf %55, %56 : vector<88x32xf32>
    %cst_28 = arith.constant 0.000000e+00 : f32
    %58 = vector.broadcast %cst_28 : f32 to vector<88x32xf32>
    %59 = arith.maximumf %57, %58 : vector<88x32xf32>
    %60 = vector.broadcast %53 : vector<88x1xf32> to vector<88x32xf32>
    %61 = arith.mulf %59, %60 : vector<88x32xf32>
    %62 = arith.truncf %61 : vector<88x32xf32> to vector<88x32xbf16>
    %63 = vector.extract_strided_slice %17 {offsets = [0, 0], sizes = [64, 32], strides = [1, 1]} : vector<88x32xbf16> to vector<64x32xbf16>
    %64 = vector.extract_strided_slice %32 {offsets = [0, 0], sizes = [64, 32], strides = [1, 1]} : vector<88x32xbf16> to vector<64x32xbf16>
    %65 = vector.extract_strided_slice %17 {offsets = [1, 0], sizes = [80, 32], strides = [1, 1]} : vector<88x32xbf16> to vector<80x32xbf16>
    %66 = vector.extract_strided_slice %65 {offsets = [0, 0], sizes = [64, 32], strides = [1, 1]} : vector<80x32xbf16> to vector<64x32xbf16>
    %67 = vector.extract_strided_slice %47 {offsets = [0, 0], sizes = [64, 32], strides = [1, 1]} : vector<88x32xbf16> to vector<64x32xbf16>
    %68 = vector.extract_strided_slice %62 {offsets = [0, 0], sizes = [64, 32], strides = [1, 1]} : vector<88x32xbf16> to vector<64x32xbf16>
    %69 = vector.extract_strided_slice %47 {offsets = [1, 0], sizes = [80, 32], strides = [1, 1]} : vector<88x32xbf16> to vector<80x32xbf16>
    %70 = vector.extract_strided_slice %69 {offsets = [0, 0], sizes = [64, 32], strides = [1, 1]} : vector<80x32xbf16> to vector<64x32xbf16>
    %71 = vector.extract_strided_slice %17 {offsets = [16, 0], sizes = [64, 32], strides = [1, 1]} : vector<88x32xbf16> to vector<64x32xbf16>
    %72 = vector.extract_strided_slice %32 {offsets = [16, 0], sizes = [64, 32], strides = [1, 1]} : vector<88x32xbf16> to vector<64x32xbf16>
    %73 = vector.extract_strided_slice %65 {offsets = [16, 0], sizes = [64, 32], strides = [1, 1]} : vector<80x32xbf16> to vector<64x32xbf16>
    %c0_29 = arith.constant 0 : index
    %c0_30 = arith.constant 0 : index
    %c0_31 = arith.constant 0 : index
    %74 = vector.load %arg6[%c0_29, %c0_30, %c0_31] : memref<9x32x32xbf16, #tpu.memory_space<vmem>>, vector<1x32x32xbf16>
    %75 = vector.shape_cast %74 : vector<1x32x32xbf16> to vector<32x32xbf16>
    %cst_32 = arith.constant dense<0.000000e+00> : vector<64x32xf32>
    %76 = tpu.matmul %63, %75, %cst_32 {dimension_numbers = #tpu.dot_dimension_numbers<[1], [0], [0], [1], [0, 0, 1, 1], [], []>} : vector<64x32xbf16>, vector<32x32xbf16>, vector<64x32xf32> -> vector<64x32xf32>
    %c1_33 = arith.constant 1 : index
    %c0_34 = arith.constant 0 : index
    %c0_35 = arith.constant 0 : index
    %77 = vector.load %arg6[%c1_33, %c0_34, %c0_35] : memref<9x32x32xbf16, #tpu.memory_space<vmem>>, vector<1x32x32xbf16>
    %78 = vector.shape_cast %77 : vector<1x32x32xbf16> to vector<32x32xbf16>
    %cst_36 = arith.constant dense<0.000000e+00> : vector<64x32xf32>
    %79 = tpu.matmul %64, %78, %cst_36 {dimension_numbers = #tpu.dot_dimension_numbers<[1], [0], [0], [1], [0, 0, 1, 1], [], []>} : vector<64x32xbf16>, vector<32x32xbf16>, vector<64x32xf32> -> vector<64x32xf32>
    %c2_37 = arith.constant 2 : index
    %c0_38 = arith.constant 0 : index
    %c0_39 = arith.constant 0 : index
    %80 = vector.load %arg6[%c2_37, %c0_38, %c0_39] : memref<9x32x32xbf16, #tpu.memory_space<vmem>>, vector<1x32x32xbf16>
    %81 = vector.shape_cast %80 : vector<1x32x32xbf16> to vector<32x32xbf16>
    %cst_40 = arith.constant dense<0.000000e+00> : vector<64x32xf32>
    %82 = tpu.matmul %66, %81, %cst_40 {dimension_numbers = #tpu.dot_dimension_numbers<[1], [0], [0], [1], [0, 0, 1, 1], [], []>} : vector<64x32xbf16>, vector<32x32xbf16>, vector<64x32xf32> -> vector<64x32xf32>
    %83 = arith.addf %76, %82 : vector<64x32xf32>
    %c3_41 = arith.constant 3 : index
    %c0_42 = arith.constant 0 : index
    %c0_43 = arith.constant 0 : index
    %84 = vector.load %arg6[%c3_41, %c0_42, %c0_43] : memref<9x32x32xbf16, #tpu.memory_space<vmem>>, vector<1x32x32xbf16>
    %85 = vector.shape_cast %84 : vector<1x32x32xbf16> to vector<32x32xbf16>
    %cst_44 = arith.constant dense<0.000000e+00> : vector<64x32xf32>
    %86 = tpu.matmul %67, %85, %cst_44 {dimension_numbers = #tpu.dot_dimension_numbers<[1], [0], [0], [1], [0, 0, 1, 1], [], []>} : vector<64x32xbf16>, vector<32x32xbf16>, vector<64x32xf32> -> vector<64x32xf32>
    %87 = arith.addf %79, %86 : vector<64x32xf32>
    %c4 = arith.constant 4 : index
    %c0_45 = arith.constant 0 : index
    %c0_46 = arith.constant 0 : index
    %88 = vector.load %arg6[%c4, %c0_45, %c0_46] : memref<9x32x32xbf16, #tpu.memory_space<vmem>>, vector<1x32x32xbf16>
    %89 = vector.shape_cast %88 : vector<1x32x32xbf16> to vector<32x32xbf16>
    %cst_47 = arith.constant dense<0.000000e+00> : vector<64x32xf32>
    %90 = tpu.matmul %68, %89, %cst_47 {dimension_numbers = #tpu.dot_dimension_numbers<[1], [0], [0], [1], [0, 0, 1, 1], [], []>} : vector<64x32xbf16>, vector<32x32xbf16>, vector<64x32xf32> -> vector<64x32xf32>
    %91 = arith.addf %83, %90 : vector<64x32xf32>
    %c5 = arith.constant 5 : index
    %c0_48 = arith.constant 0 : index
    %c0_49 = arith.constant 0 : index
    %92 = vector.load %arg6[%c5, %c0_48, %c0_49] : memref<9x32x32xbf16, #tpu.memory_space<vmem>>, vector<1x32x32xbf16>
    %93 = vector.shape_cast %92 : vector<1x32x32xbf16> to vector<32x32xbf16>
    %cst_50 = arith.constant dense<0.000000e+00> : vector<64x32xf32>
    %94 = tpu.matmul %70, %93, %cst_50 {dimension_numbers = #tpu.dot_dimension_numbers<[1], [0], [0], [1], [0, 0, 1, 1], [], []>} : vector<64x32xbf16>, vector<32x32xbf16>, vector<64x32xf32> -> vector<64x32xf32>
    %95 = arith.addf %87, %94 : vector<64x32xf32>
    %c6 = arith.constant 6 : index
    %c0_51 = arith.constant 0 : index
    %c0_52 = arith.constant 0 : index
    %96 = vector.load %arg6[%c6, %c0_51, %c0_52] : memref<9x32x32xbf16, #tpu.memory_space<vmem>>, vector<1x32x32xbf16>
    %97 = vector.shape_cast %96 : vector<1x32x32xbf16> to vector<32x32xbf16>
    %cst_53 = arith.constant dense<0.000000e+00> : vector<64x32xf32>
    %98 = tpu.matmul %71, %97, %cst_53 {dimension_numbers = #tpu.dot_dimension_numbers<[1], [0], [0], [1], [0, 0, 1, 1], [], []>} : vector<64x32xbf16>, vector<32x32xbf16>, vector<64x32xf32> -> vector<64x32xf32>
    %99 = arith.addf %91, %98 : vector<64x32xf32>
    %c7 = arith.constant 7 : index
    %c0_54 = arith.constant 0 : index
    %c0_55 = arith.constant 0 : index
    %100 = vector.load %arg6[%c7, %c0_54, %c0_55] : memref<9x32x32xbf16, #tpu.memory_space<vmem>>, vector<1x32x32xbf16>
    %101 = vector.shape_cast %100 : vector<1x32x32xbf16> to vector<32x32xbf16>
    %cst_56 = arith.constant dense<0.000000e+00> : vector<64x32xf32>
    %102 = tpu.matmul %72, %101, %cst_56 {dimension_numbers = #tpu.dot_dimension_numbers<[1], [0], [0], [1], [0, 0, 1, 1], [], []>} : vector<64x32xbf16>, vector<32x32xbf16>, vector<64x32xf32> -> vector<64x32xf32>
    %103 = arith.addf %95, %102 : vector<64x32xf32>
    %c8 = arith.constant 8 : index
    %c0_57 = arith.constant 0 : index
    %c0_58 = arith.constant 0 : index
    %104 = vector.load %arg6[%c8, %c0_57, %c0_58] : memref<9x32x32xbf16, #tpu.memory_space<vmem>>, vector<1x32x32xbf16>
    %105 = vector.shape_cast %104 : vector<1x32x32xbf16> to vector<32x32xbf16>
    %cst_59 = arith.constant dense<0.000000e+00> : vector<64x32xf32>
    %106 = tpu.matmul %73, %105, %cst_59 {dimension_numbers = #tpu.dot_dimension_numbers<[1], [0], [0], [1], [0, 0, 1, 1], [], []>} : vector<64x32xbf16>, vector<32x32xbf16>, vector<64x32xf32> -> vector<64x32xf32>
    %107 = arith.addf %99, %106 : vector<64x32xf32>
    %108 = arith.addf %107, %103 : vector<64x32xf32>
    %c0_60 = arith.constant 0 : index
    %c0_61 = arith.constant 0 : index
    %109 = vector.load %arg7[%c0_60, %c0_61] : memref<1x32xf32, #tpu.memory_space<vmem>>, vector<1x32xf32>
    %110 = vector.broadcast %109 : vector<1x32xf32> to vector<64x32xf32>
    %111 = arith.addf %108, %110 : vector<64x32xf32>
    %cst_62 = arith.constant 0.000000e+00 : f32
    %112 = vector.broadcast %cst_62 : f32 to vector<64x32xf32>
    %113 = arith.maximumf %111, %112 : vector<64x32xf32>
    %114 = arith.truncf %113 : vector<64x32xf32> to vector<64x32xbf16>
    %c0_63 = arith.constant 0 : index
    %c0_64 = arith.constant 0 : index
    %115 = vector.load %arg8[%c0_63, %c0_64] : memref<32x128xbf16, #tpu.memory_space<vmem>>, vector<32x128xbf16>
    %cst_65 = arith.constant dense<0.000000e+00> : vector<64x128xf32>
    %116 = tpu.matmul %114, %115, %cst_65 {dimension_numbers = #tpu.dot_dimension_numbers<[1], [0], [0], [1], [0, 0, 1, 1], [], []>} : vector<64x32xbf16>, vector<32x128xbf16>, vector<64x128xf32> -> vector<64x128xf32>
    %c0_66 = arith.constant 0 : index
    %c0_67 = arith.constant 0 : index
    %117 = vector.load %arg9[%c0_66, %c0_67] : memref<1x128xf32, #tpu.memory_space<vmem>>, vector<1x128xf32>
    %118 = vector.broadcast %117 : vector<1x128xf32> to vector<64x128xf32>
    %119 = arith.addf %116, %118 : vector<64x128xf32>
    %c0_68 = arith.constant 0 : index
    %c0_69 = arith.constant 0 : index
    %c0_70 = arith.constant 0 : index
    %120 = vector.load %arg10[%c0_68, %c0_69, %c0_70] : memref<1x64x64xbf16, #tpu.memory_space<vmem>>, vector<1x64x64xbf16>
    %121 = vector.shape_cast %120 : vector<1x64x64xbf16> to vector<64x64xbf16>
    %c0_71 = arith.constant 0 : index
    %c0_72 = arith.constant 0 : index
    %122 = vector.load %arg11[%c0_71, %c0_72] : memref<64x128xbf16, #tpu.memory_space<vmem>>, vector<64x128xbf16>
    %cst_73 = arith.constant dense<0.000000e+00> : vector<64x128xf32>
    %123 = tpu.matmul %121, %122, %cst_73 {dimension_numbers = #tpu.dot_dimension_numbers<[1], [0], [0], [1], [0, 0, 1, 1], [], []>} : vector<64x64xbf16>, vector<64x128xbf16>, vector<64x128xf32> -> vector<64x128xf32>
    %c0_74 = arith.constant 0 : index
    %c0_75 = arith.constant 0 : index
    %124 = vector.load %arg12[%c0_74, %c0_75] : memref<1x128xf32, #tpu.memory_space<vmem>>, vector<1x128xf32>
    %125 = vector.broadcast %124 : vector<1x128xf32> to vector<64x128xf32>
    %126 = arith.addf %123, %125 : vector<64x128xf32>
    %127 = arith.addf %119, %126 : vector<64x128xf32>
    %cst_76 = arith.constant 0.000000e+00 : f32
    %128 = vector.broadcast %cst_76 : f32 to vector<64x128xf32>
    %129 = arith.maximumf %127, %128 : vector<64x128xf32>
    %130 = arith.truncf %129 : vector<64x128xf32> to vector<64x128xbf16>
    %c0_77 = arith.constant 0 : index
    %c0_78 = arith.constant 0 : index
    %c0_79 = arith.constant 0 : index
    %131 = vector.load %arg13[%c0_77, %c0_78, %c0_79] : memref<1x64x128xbf16, #tpu.memory_space<vmem>>, vector<1x64x128xbf16>
    %132 = vector.shape_cast %131 : vector<1x64x128xbf16> to vector<64x128xbf16>
    %133 = vector.shape_cast %130 : vector<64x128xbf16> to vector<1x64x128xbf16>
    tpu.vector_store %arg13[%c0_77, %c0_78, %c0_79], %133 {strides = array<i32>} : memref<1x64x128xbf16, #tpu.memory_space<vmem>>, vector<1x64x128xbf16>,
    return
  }
  func.func @transform_0(%arg0: i32, %arg1: i32) -> (i32, i32, i32) {
    %c0_i32 = arith.constant 0 : i32
    %c0_i32_0 = arith.constant 0 : i32
    %c0_i32_1 = arith.constant 0 : i32
    return %arg0, %c0_i32, %c0_i32_0 : i32, i32, i32
  }
  func.func @transform_1(%arg0: i32, %arg1: i32) -> (i32, i32, i32) {
    %c0_i32 = arith.constant 0 : i32
    %c0_i32_0 = arith.constant 0 : i32
    %c0_i32_1 = arith.constant 0 : i32
    %c0_i32_2 = arith.constant 0 : i32
    return %c0_i32, %c0_i32_0, %c0_i32_1 : i32, i32, i32
  }
  func.func @transform_2(%arg0: i32, %arg1: i32) -> (i32, i32) {
    %c0_i32 = arith.constant 0 : i32
    %c0_i32_0 = arith.constant 0 : i32
    %c0_i32_1 = arith.constant 0 : i32
    return %c0_i32, %c0_i32_0 : i32, i32
  }
  func.func @transform_3(%arg0: i32, %arg1: i32) -> (i32, i32) {
    %c0_i32 = arith.constant 0 : i32
    %c0_i32_0 = arith.constant 0 : i32
    %c0_i32_1 = arith.constant 0 : i32
    return %c0_i32, %c0_i32_0 : i32, i32
  }
  func.func @transform_4(%arg0: i32, %arg1: i32) -> (i32, i32, i32) {
    %c0_i32 = arith.constant 0 : i32
    %c0_i32_0 = arith.constant 0 : i32
    %c0_i32_1 = arith.constant 0 : i32
    %c0_i32_2 = arith.constant 0 : i32
    return %c0_i32, %c0_i32_0, %c0_i32_1 : i32, i32, i32
  }
  func.func @transform_5(%arg0: i32, %arg1: i32) -> (i32, i32) {
    %c0_i32 = arith.constant 0 : i32
    %c0_i32_0 = arith.constant 0 : i32
    %c0_i32_1 = arith.constant 0 : i32
    return %c0_i32, %c0_i32_0 : i32, i32
  }
  func.func @transform_6(%arg0: i32, %arg1: i32) -> (i32, i32) {
    %c0_i32 = arith.constant 0 : i32
    %c0_i32_0 = arith.constant 0 : i32
    %c0_i32_1 = arith.constant 0 : i32
    return %c0_i32, %c0_i32_0 : i32, i32
  }
  func.func @transform_7(%arg0: i32, %arg1: i32) -> (i32, i32) {
    %c0_i32 = arith.constant 0 : i32
    %c0_i32_0 = arith.constant 0 : i32
    %c0_i32_1 = arith.constant 0 : i32
    return %c0_i32, %c0_i32_0 : i32, i32
  }
  func.func @transform_8(%arg0: i32, %arg1: i32) -> (i32, i32, i32) {
    %c0_i32 = arith.constant 0 : i32
    %c0_i32_0 = arith.constant 0 : i32
    return %arg0, %arg1, %c0_i32 : i32, i32, i32
  }
  func.func @transform_9(%arg0: i32, %arg1: i32) -> (i32, i32) {
    %c0_i32 = arith.constant 0 : i32
    %c0_i32_0 = arith.constant 0 : i32
    %c0_i32_1 = arith.constant 0 : i32
    return %c0_i32, %c0_i32_0 : i32, i32
  }
  func.func @transform_10(%arg0: i32, %arg1: i32) -> (i32, i32) {
    %c0_i32 = arith.constant 0 : i32
    %c0_i32_0 = arith.constant 0 : i32
    %c0_i32_1 = arith.constant 0 : i32
    return %c0_i32, %c0_i32_0 : i32, i32
  }
  func.func @transform_11(%arg0: i32, %arg1: i32) -> (i32, i32, i32) {
    %c0_i32 = arith.constant 0 : i32
    %c0_i32_0 = arith.constant 0 : i32
    return %arg0, %arg1, %c0_i32 : i32, i32, i32
  }
}

</mosaic_0001>

<bundles_post_ra>
// kernel: bottleneck_forward.1
= control target key start
LH: loop header
LB: loop body
LE: loop exit
PB: predicated region body
PF: predicated region fallthrough
CT: control target
= control target key end

     0   :  { %s3674_s17 = smov 0   ;;  %s3676_s18 = smov 0   ;;  %s4250_s0 = inlined_call_operand.vmem [shape: bf16[8,152,64], index: 0, kind: input, shape index: {}]   ;;  %s4251_s1 = inlined_call_operand.vmem [shape: f32[4,152,1], index: 1, kind: input, shape index: {}]   ;;  %s4252_s2 = inlined_call_operand.vmem [shape: bf16[64,32], index: 2, kind: input, shape index: {}]   ;;  %s4253_s3 = inlined_call_operand.vmem [shape: f32[1,32], index: 3, kind: input, shape index: {}]   ;;  %s4254_s4 = inlined_call_operand.vmem [shape: bf16[9,32,32], index: 4, kind: input, shape index: {}]   ;;  %s4255_s5 = inlined_call_operand.vmem [shape: f32[1,32], index: 5, kind: input, shape index: {}]   ;;  %s4256_s6 = inlined_call_operand.vmem [shape: bf16[32,128], index: 6, kind: input, shape index: {}]   ;;  %s4257_s7 = inlined_call_operand.vmem [shape: f32[1,128], index: 7, kind: input, shape index: {}]   ;;  %s4258_s8 = inlined_call_operand.vmem [shape: bf16[2,128,64], index: 8, kind: input, shape index: {}]   ;;  %s4259_s9 = inlined_call_operand.vmem [shape: bf16[64,128], index: 9, kind: input, shape index: {}]   ;;  %s4260_s10 = inlined_call_operand.vmem [shape: f32[1,128], index: 10, kind: input, shape index: {}]   ;;  %s4261_s11 = inlined_call_operand.vmem [shape: bf16[2,128,128], index: 11, kind: output, shape index: {}]  }
   0x1   :  { %s3678_s19 = smov 0   ;;  %s3680_s20 = smov 0  }
   0x2   :  { %s3682_s21 = smov 0  }
   0x3 LB: > { %s30_s22 = sadd.s32 1, %s3603_s19  ;;  %s33_s23 = sadd.s32 1, %s3607_s20  ;;  %s3611_s21 = sphi %s3682_s21, %s21_s21   ;;  %s3607_s20 = sphi %s3680_s20, %s4265_s20   ;;  %s3603_s19 = sphi %s3678_s19, %s4264_s19   ;;  %s3599_s18 = sphi %s3676_s18, %s4263_s18   ;;  %s3595_s17 = sphi %s3674_s17, %s4262_s17  }
   0x4   : > { %p31_p0 = scmp.ge.s32.totalorder %s30_s22, 2  ;;  %p2782_p1 = scmp.ge.s32.totalorder %s3611_s21, 1 }
   0x5   : > { %p370_p2 = scmp.lt.s32.totalorder %s3611_s21, 5 }
   0x6   : > { %s4267_s22 = smov (%p31_p0, %s30_s22), 0  ;;  %s4269_s23 = smov (!%p31_p0, %s33_s23), %s3607_s20 }
   0x7   : > { %p371_p3 = pnand %p2782_p1, %p370_p2  ;;  %p35_p4 = scmp.ge.s32.totalorder %s4269_s23, 2 }
   0x8   : > { %v3711_v0 = vld [vmem:[%s4252_s2] sm:$0xff] (!%p371_p3)   ;;  %s2783_s26 = sshll.u32 (!%p371_p3), %s3599_s18, 2  ;;  %v3717_v1 = vld [vmem:[%s4252_s2 + $0x8] sm:$0xff] (!%p371_p3)   ;;  %s2791_s29 = sshll.u32 (!%p371_p3), %s3595_s17, 6  ;;  %v3726_v2 = vld [vmem:[%s4252_s2 + $0x10] sm:$0xff] (!%p371_p3)   ;;  %v3613_v3 = vmov (!%p371_p3), 0  }
   0x9   : > { %s4271_s23 = smov (%p35_p4, %s4269_s23), 0  ;;  %374 = sbr.rel (%p371_p3) target bundleno = 862 (0x35e), region = 64 }
   0xa   : > { %p425_p5 = scmp.lt.s32.totalorder (!%p371_p3), %s2783_s26, 7  ;;  %3169 = vmatprep.subr.bf16.mxu1 (!%p371_p3), %v3711_v0  ;;  %s454_s13 = sshra.s32 (!%p371_p3), %s2791_s29, 3  ;;  %3515 = vset.pattern.permute.xlu0 (!%p371_p3), %v3613_v3  ;;  %v3745_v8 = vld [vmem:[%s4252_s2 + $0x18] sm:$0xff] (!%p371_p3)   ;;  %vm547_vm0 = vcmask (!%p371_p3), 523264   ;;  %vm1402_vm1 = vsmask.f32 (!%p371_p3), 7424 }
   0xb   : > { %3170 = vmatpush3.bf16.msra.mxu1 (!%p371_p3), %v3711_v0  ;;  %s3731_s16 = scalar_lea.vmem (!%p371_p3), %s4251_s1, %s2791_s29  ;;  %s2792_s25 = sshll.u32 (!%p371_p3), %s454_s13, 2  ;;  %3516 = vset.pattern.permute.xlu1 (!%p371_p3), %v3613_v3  ;;  %v3544_v3 = vld [vmem:[%s4254_s4 + $0x28] sm:$0xff] (!%p371_p3)   ;;  %vm1451_vm2 = vcmask (!%p371_p3), 261120  }
   0xc   : > { %3171 = vmatprep.subr.bf16.mxu1 (!%p371_p3), %v3717_v1  ;;  %v470_v4 = vld [vmem:[%s3731_s16] sm:$0xff] (!%p371_p3)  ;;  %v472_v5 = vld [vmem:[%s3731_s16 + $0x10] sm:$0xff] (!%p371_p3)  ;;  %v471_v6 = vld [vmem:[%s3731_s16 + $0x8] sm:$0xff] (!%p371_p3)  ;;  %s2785_s13 = sshll.u32 (!%p371_p3), %s3595_s17, 3  ;;  %p432_p6 = scmp.lt.s32.totalorder (!%p371_p3), %s3599_s18, 1 }
   0xd   : > { %659 = vperm.xlu0 (!%p371_p3), %3515, %v470_v4   ;;  %669 = vperm.xlu1 (!%p371_p3), %3516, %v472_v5   ;;  %v473_v7 = vld [vmem:[%s3731_s16 + $0x18] sm:$0xff] (!%p371_p3)  ;;  %v474_v10 = vld [vmem:[%s3731_s16 + $0x20] sm:$0xff] (!%p371_p3)  ;;  %v475_v11 = vld [vmem:[%s3731_s16 + $0x28] sm:$0xff] (!%p371_p3)  ;;  %p434_p7 = scmp.lt.s32.totalorder (!%p371_p3), %s2785_s13, 15 }
   0xe   : > { %v476_v12 = vld [vmem:[%s3731_s16 + $0x30] sm:$0xff] (!%p371_p3)  ;;  %v477_v15 = vld [vmem:[%s3731_s16 + $0x38] sm:$0xff] (!%p371_p3)  ;;  %v478_v16 = vld [vmem:[%s3731_s16 + $0x40] sm:$0xff] (!%p371_p3) }
   0xf   : > { %3172 = vmatpush3.bf16.msra.mxu1 (!%p371_p3), %v3717_v1  ;;  %v479_v17 = vld [vmem:[%s3731_s16 + $0x48] sm:$0xff] (!%p371_p3)  ;;  %v2858_v20 = vld [vmem:[%s3731_s16 + $0x130] sm:$0xff] (!%p371_p3)  ;;  %v2859_v21 = vld [vmem:[%s3731_s16 + $0x138] sm:$0xff] (!%p371_p3) }
  0x10   : > { %s4273_s26 = smov (!%p425_p5, %s2783_s26), 7  ;;  %3173 = vmatprep.subr.bf16.mxu1 %v3726_v2  ;;  %v2860_v22 = vld [vmem:[%s3731_s16 + $0x140] sm:$0xff]  ;;  %v2861_v23 = vld [vmem:[%s3731_s16 + $0x148] sm:$0xff]  ;;  %v2862_v26 = vld [vmem:[%s3731_s16 + $0x150] sm:$0xff]  ;;  %s4275_s18 = smov (!%p432_p6, %s3599_s18), 1 }
  0x11   : > { %s3473_s24 = smul.u32 76, %s4273_s26  ;;  %664 = vperm.xlu0 %3515, %v471_v6   ;;  %674 = vperm.xlu1 %3516, %v473_v7   ;;  %v2863_v27 = vld [vmem:[%s3731_s16 + $0x158] sm:$0xff]  ;;  %v2864_v28 = vld [vmem:[%s3731_s16 + $0x160] sm:$0xff]  ;;  %v2865_v29 = vld [vmem:[%s3731_s16 + $0x168] sm:$0xff]  ;;  %s4277_s13 = smov (!%p434_p7, %s2785_s13), 15 }
  0x12   : > { %v2823_v32 = vld [vmem:[%s3731_s16 + $0x98] sm:$0xff]  ;;  %v2824_v33 = vld [vmem:[%s3731_s16 + $0xa0] sm:$0xff]  ;;  %v2825_v34 = vld [vmem:[%s3731_s16 + $0xa8] sm:$0xff]  ;;  %s2786_s14 = sshll.u32 %s4275_s18, 4 }
  0x13   : > { %s429_s29 = scalar_lea.vmem %s4250_s0, %s3473_s24  ;;  %3174 = vmatpush3.bf16.msra.mxu1 %v3726_v2  ;;  %v2826_v35 = vld [vmem:[%s3731_s16 + $0xb0] sm:$0xff]  ;;  %v2827_v38 = vld [vmem:[%s3731_s16 + $0xb8] sm:$0xff]  ;;  %v2828_v39 = vld [vmem:[%s3731_s16 + $0xc0] sm:$0xff]  ;;  %s4190_s15 = sadd.s32 %s2786_s14, %s4277_s13 }
  0x14   : > { %s3747_s12 = scalar_lea.vmem %s429_s29, %s2792_s25  ;;  %3175 = vmatprep.subr.bf16.mxu1 %v3745_v8  ;;  %v2829_v40 = vld [vmem:[%s3731_s16 + $0xc8] sm:$0xff]  ;;  %v2830_v41 = vld [vmem:[%s3731_s16 + $0xd0] sm:$0xff]  ;;  %v2895_v46 = vld [vmem:[%s3731_s16 + $0x1d8] sm:$0xff] }
  0x15   : > { %v3521_v9 = vld [vmem:[%s3747_s12] sm:$0xff]   ;;  %v3522_v13 = vld [vmem:[%s3747_s12 + $0x8] sm:$0xff]   ;;  %679 = vperm.xlu0 %3515, %v474_v10   ;;  %684 = vperm.xlu1 %3516, %v475_v11   ;;  %v3523_v14 = vld [vmem:[%s3747_s12 + $0x10] sm:$0xff]  }
  0x16   : > { %3177 = vmatprep.mubr.msk.bf16.mxu1 %vm547_vm0, %v3521_v9  ;;  %v3524_v18 = vld [vmem:[%s3747_s12 + $0x18] sm:$0xff]   ;;  %v3525_v19 = vld [vmem:[%s3747_s12 + $0x20] sm:$0xff]   ;;  %v3526_v24 = vld [vmem:[%s3747_s12 + $0x28] ss:$0 sps:$4 sm:$0xff]  }
  0x17   : > { %3176 = vmatpush3.bf16.msra.mxu1 %v3745_v8  ;;  %v3527_v25 = vld [vmem:[%s3747_s12 + $0x4c] sm:$0xff]   ;;  %v3528_v30 = vld [vmem:[%s3747_s12 + $0x54] sm:$0xff]   ;;  %v3529_v31 = vld [vmem:[%s3747_s12 + $0x5c] sm:$0xff]  }
  0x18   : > { %3189 = vmatprep.subr.bf16.mxu1 %v3711_v0  ;;  %v3530_v36 = vld [vmem:[%s3747_s12 + $0x64] sm:$0xff]   ;;  %v3531_v37 = vld [vmem:[%s3747_s12 + $0x6c] sm:$0xff]   ;;  %v3532_v42 = vld [vmem:[%s3747_s12 + $0x74] ss:$0 sps:$4 sm:$0xff]  }
  0x19   : > { %689 = vperm.xlu0 %3515, %v476_v12   ;;  %694 = vperm.xlu1 %3516, %v477_v15   ;;  %v3533_v43 = vld [vmem:[%s3747_s12 + $0x98] sm:$0xff]   ;;  %v2893_v44 = vld [vmem:[%s3731_s16 + $0x1c8] sm:$0xff]  ;;  %v2894_v45 = vld [vmem:[%s3731_s16 + $0x1d0] sm:$0xff] }
  0x1a   : > { %3178 = vmatmul.mubr.msk.bf16.vlgmr.msra.gmra.mrb[0].mxu1 %vm547_vm0, %v3522_v13  ;;  %v2896_v47 = vld [vmem:[%s3731_s16 + $0x1e0] sm:$0xff]  ;;  %v3535_v49 = vld [vmem:[%s3747_s12 + $0xa8] sm:$0xff]   ;;  %v2898_v51 = vld [vmem:[%s3731_s16 + $0x1f0] sm:$0xff] }
  0x1b   : > { %3190 = vmatpush3.bf16.msra.mxu1 %v3711_v0  ;;  %3181 = vmatprep.mubr.msk.bf16.mxu1 %vm547_vm0, %v3523_v14  ;;  %v3534_v48 = vld [vmem:[%s3747_s12 + $0xa0] sm:$0xff]   ;;  %v2897_v50 = vld [vmem:[%s3731_s16 + $0x1e8] sm:$0xff]  ;;  %v2899_v52 = vld [vmem:[%s3731_s16 + $0x1f8] sm:$0xff] }
  0x1c   : > { %3191 = vmatprep.subr.bf16.mxu1 %v3717_v1  ;;  %v2900_v53 = vld [vmem:[%s3731_s16 + $0x200] sm:$0xff]  ;;  %v3536_v54 = vld [vmem:[%s3747_s12 + $0xb0] sm:$0xff]   ;;  %v3537_v55 = vld [vmem:[%s3747_s12 + $0xb8] sm:$0xff]  }
  0x1d   : > { %699 = vperm.xlu0 %3515, %v478_v16   ;;  %704 = vperm.xlu1 %3516, %v479_v17   ;;  %v2866_v56 = vld [vmem:[%s3731_s16 + $0x170] sm:$0xff]  ;;  %v2867_v57 = vld [vmem:[%s3731_s16 + $0x178] sm:$0xff]  ;;  %v2832_v59 = vld [vmem:[%s3731_s16 + $0xe0] sm:$0xff] }
  0x1e   : > { %v2831_v58 = vld [vmem:[%s3731_s16 + $0xd8] sm:$0xff]  ;;  %v3538_v60 = vld [vmem:[%s3747_s12 + $0xc0] ss:$0 sps:$4 sm:$0xff]   ;;  %v3539_v61 = vld [vmem:[%s3747_s12 + $0xe4] sm:$0xff]  }
  0x1f   : > { %3192 = vmatpush3.bf16.msra.mxu1 %v3717_v1  ;;  %v480_v62 = vld [vmem:[%s3731_s16 + $0x50] sm:$0xff]  ;;  %v3864_v4 = vld [vmem:[%s4254_s4] sm:$0xff]   ;;  %s2787_s16 = sshll.u32 %s4190_s15, 2 }
  0x20   : > { %3193 = vmatprep.subr.bf16.mxu1 %v3726_v2  ;;  %v3540_v63 = vld [vmem:[%s3747_s12 + $0xec] sm:$0xff]   ;;  %s4198_s25 = scalar_lea.vmem %s4258_s8, %s2787_s16  ;;  %s449_s17 = scalar_lea.vmem %s4261_s11, %s2787_s16 }
  0x21   : > { %1118 = vperm.xlu0 %3515, %v2858_v20   ;;  %1123 = vperm.xlu1 %3516, %v2859_v21  }
  0x22   : > { %3182 = vmatmul.mubr.msk.bf16.gmra.mrb[4].mxu1 %vm547_vm0, %v3524_v18 }
  0x23   : > { %3194 = vmatpush3.bf16.msra.mxu1 %v3726_v2  ;;  %3185 = vmatprep.mubr.msk.bf16.mxu1 %vm547_vm0, %v3525_v19 }
  0x24   : > { %3195 = vmatprep.subr.bf16.mxu1 %v3745_v8 }
  0x25   : > { %1128 = vperm.xlu0 %3515, %v2860_v22   ;;  %1133 = vperm.xlu1 %3516, %v2861_v23  }
  0x27   : > { %3196 = vmatpush3.bf16.msra.mxu1 %v3745_v8 }
  0x28   : > { %3209 = vmatprep.subr.bf16.mxu1 %v3711_v0 }
  0x29   : > { %1138 = vperm.xlu0 %3515, %v2862_v26   ;;  %1143 = vperm.xlu1 %3516, %v2863_v27  }
  0x2a   : > { %3186 = vmatmul.mubr.msk.bf16.gmra.mrb[8].mxu1 %vm547_vm0, %v3526_v24 }
  0x2b   : > { %3197 = vmatprep.mubr.msk.bf16.mxu1 %vm547_vm0, %v3527_v25 }
  0x2d   : > { %1148 = vperm.xlu0 %3515, %v2864_v28   ;;  %1153 = vperm.xlu1 %3516, %v2865_v29  }
  0x31   : > { %892 = vperm.xlu0 %3515, %v2823_v32   ;;  %897 = vperm.xlu1 %3516, %v2824_v33  }
  0x32   : > { %3198 = vmatmul.mubr.msk.bf16.vlgmr.msra.gmra.mrb[12].mxu1 %vm547_vm0, %v3528_v30 }
  0x33   : > { %3210 = vmatpush3.bf16.msra.mxu1 %v3711_v0  ;;  %3201 = vmatprep.mubr.msk.bf16.mxu1 %vm547_vm0, %v3529_v31  ;;  %v3910_v31 = vld [vmem:[%s4253_s3] ss:$0 sm:$0xff] }
  0x34   : > { %3211 = vmatprep.subr.bf16.mxu1 %v3717_v1 }
  0x35   : > { %902 = vperm.xlu0 %3515, %v2825_v34   ;;  %907 = vperm.xlu1 %3516, %v2826_v35  }
  0x37   : > { %3212 = vmatpush3.bf16.msra.mxu1 %v3717_v1 }
  0x38   : > { %3213 = vmatprep.subr.bf16.mxu1 %v3726_v2 }
  0x39   : > { %912 = vperm.xlu0 %3515, %v2827_v38   ;;  %917 = vperm.xlu1 %3516, %v2828_v39  }
  0x3a   : > { %3202 = vmatmul.mubr.msk.bf16.gmra.mrb[16].mxu1 %vm547_vm0, %v3530_v36 }
  0x3b   : > { %3214 = vmatpush3.bf16.msra.mxu1 %v3726_v2  ;;  %3205 = vmatprep.mubr.msk.bf16.mxu1 %vm547_vm0, %v3531_v37 }
  0x3c   : > { %3215 = vmatprep.subr.bf16.mxu1 %v3745_v8 }
  0x3d   : > { %922 = vperm.xlu0 %3515, %v2829_v40   ;;  %927 = vperm.xlu1 %3516, %v2830_v41  }
  0x3f   : > { %3216 = vmatpush3.bf16.msra.mxu1 %v3745_v8 }
  0x40   : > { %3229 = vmatprep.subr.bf16.mxu1 %v3711_v0 }
  0x41   : > { %1338 = vperm.xlu0 %3515, %v2893_v44   ;;  %1343 = vperm.xlu1 %3516, %v2894_v45  }
  0x42   : > { %3206 = vmatmul.mubr.msk.bf16.gmra.mrb[20].mxu1 %vm547_vm0, %v3532_v42 }
  0x43   : > { %3217 = vmatprep.mubr.msk.bf16.mxu1 %vm547_vm0, %v3533_v43 }
  0x45   : > { %1348 = vperm.xlu0 %3515, %v2895_v46   ;;  %1353 = vperm.xlu1 %3516, %v2896_v47  }
  0x49   : > { %1358 = vperm.xlu0 %3515, %v2897_v50   ;;  %1363 = vperm.xlu1 %3516, %v2898_v51  }
  0x4a   : > { %3218 = vmatmul.mubr.msk.bf16.vlgmr.msra.gmra.mrb[24].mxu1 %vm547_vm0, %v3534_v48 }
  0x4b   : > { %3221 = vmatprep.mubr.msk.bf16.mxu1 %vm547_vm0, %v3535_v49  ;;  %3230 = vmatpush3.bf16.msra.mxu1 %v3711_v0  ;;  %v3541_v0 = vld [vmem:[%s3747_s12 + $0xf4] sm:$0xff]  }
  0x4c   : > { %3231 = vmatprep.subr.bf16.mxu1 %v3717_v1 }
  0x4d   : > { %1368 = vperm.xlu0 %3515, %v2899_v52   ;;  %1373 = vperm.xlu1 %3516, %v2900_v53  }
  0x4f   : > { %3232 = vmatpush3.bf16.msra.mxu1 %v3717_v1  ;;  %v3542_v1 = vld [vmem:[%s3747_s12 + $0xfc] sm:$0xff]  }
  0x50   : > { %3233 = vmatprep.subr.bf16.mxu1 %v3726_v2 }
  0x51   : > { %1158 = vperm.xlu0 %3515, %v2866_v56   ;;  %1163 = vperm.xlu1 %3516, %v2867_v57  }
  0x52   : > { %3222 = vmatmul.mubr.msk.bf16.gmra.mrb[28].mxu1 %vm547_vm0, %v3536_v54 }
  0x53   : > { %3225 = vmatprep.mubr.msk.bf16.mxu1 %vm547_vm0, %v3537_v55  ;;  %3234 = vmatpush3.bf16.msra.mxu1 %v3726_v2  ;;  %v3543_v2 = vld [vmem:[%s4254_s4 + $0x20] sm:$0xff]  }
  0x54   : > { %3235 = vmatprep.subr.bf16.mxu1 %v3745_v8  ;;  %3249 = vmatprep.subr.bf16.mxu0 %v3543_v2 }
  0x55   : > { %932 = vperm.xlu0 %3515, %v2831_v58   ;;  %937 = vperm.xlu1 %3516, %v2832_v59  }
  0x56   : > { %3250 = vmatpush3.bf16.msra.mxu0 %v3543_v2 }
  0x57   : > { %3236 = vmatpush3.bf16.msra.mxu1 %v3745_v8  ;;  %3251 = vmatprep.subr.bf16.mxu0 %v3544_v3 }
  0x59   : > { %709 = vperm.xlu0 %3515, %v480_v62  }
  0x5a   : > { %3226 = vmatmul.mubr.msk.bf16.gmra.mrb[32].mxu1 %vm547_vm0, %v3538_v60  ;;  %3252 = vmatpush3.bf16.msra.mxu0 %v3544_v3 }
  0x5b   : > { %3237 = vmatprep.mubr.msk.bf16.mxu1 %vm547_vm0, %v3539_v61  ;;  %3261 = vmatprep.subr.bf16.mxu0 %v3864_v4 }
  0x62   : > { %3238 = vmatmul.mubr.msk.bf16.vlgmr.msra.gmra.mrb[36].mxu1 %vm547_vm0, %v3540_v63 }
  0x63   : > { %3241 = vmatprep.mubr.msk.bf16.mxu1 %vm547_vm0, %v3541_v0 }
  0x6a   : > { %3242 = vmatmul.mubr.msk.bf16.gmra.mrb[40].mxu1 %vm547_vm0, %v3542_v1 }
  0x8c   : > { %v660_v5 = vpop.permute.xlu0 %659  ;;  %v670_v11 = vpop.permute.xlu1 %669 }
  0x90   : > { %v665_v6 = vpop.permute.xlu0 %664  ;;  %v675_v13 = vpop.permute.xlu1 %674 }
  0x94   : > { %v3867_v7 = vpop.permute.xlu0 %679  ;;  %v685_v15 = vpop.permute.xlu1 %684 }
  0x98   : > { %v3869_v8 = vpop.permute.xlu0 %689  ;;  %v695_v17 = vpop.permute.xlu1 %694 }
  0x9c   : > { %v3871_v9 = vpop.permute.xlu0 %699  ;;  %v3883_v19 = vpop.permute.xlu1 %704 }
  0xa0   : > { %v3873_v10 = vpop.permute.xlu0 %1118  ;;  %v3887_v21 = vpop.permute.xlu1 %1123 }
  0xa4   : > { %v3875_v12 = vpop.permute.xlu0 %1128  ;;  %v3891_v23 = vpop.permute.xlu1 %1133 }
  0xa8   : > { %v3877_v14 = vpop.permute.xlu0 %1138  ;;  %v3895_v25 = vpop.permute.xlu1 %1143 }
  0xac   : > { %v3879_v16 = vpop.permute.xlu0 %1148  ;;  %v3899_v27 = vpop.permute.xlu1 %1153 }
  0xb0   : > { %v3881_v18 = vpop.permute.xlu0 %892  ;;  %v3903_v29 = vpop.permute.xlu1 %897 }
  0xb4   : > { %v3885_v20 = vpop.permute.xlu0 %902  ;;  %v3912_v32 = vpop.permute.xlu1 %907 }
  0xb8   : > { %v3889_v22 = vpop.permute.xlu0 %912  ;;  %v3920_v44 = vpop.permute.xlu1 %917 }
  0xbc   : > { %v3893_v24 = vpop.permute.xlu0 %922  ;;  %v3930_v59 = vpop.permute.xlu1 %927 }
  0xc0   : > { %v3897_v26 = vpop.permute.xlu0 %1338 }
  0xc4   : > { %v3901_v28 = vpop.permute.xlu0 %1348 }
  0xc8   : > { %v3905_v30 = vpop.permute.xlu0 %1358 }
  0xcc   : > { %v3915_v36 = vpop.permute.xlu0 %1368 }
  0xd0   : > { %v3922_v51 = vpop.permute.xlu0 %1158 }
  0xed   : > { %v3179_v33 = vpop.f32.mrb[0].mxu1 }
  0xee   : > { %v609_v34 = vadd.f32 %v3179_v33, %v3910_v31  ;;  %v600_v35 = vpop.f32.mrb[1].mxu1 }
  0xef   : > { %v601_v37 = vadd.f32 %v3910_v31, %v600_v35  ;;  %v3180_v38 = vpop.f32.mrb[2].mxu1 }
  0xf0   : > { %v648_v39 = vmax.f32 %v609_v34, 0.0  ;;  %v612_v40 = vadd.f32 %v3180_v38, %v3910_v31  ;;  %v603_v41 = vpop.f32.mrb[3].mxu1 }
  0xf1   : > { %v646_v42 = vmax.f32 %v601_v37, 0.0  ;;  %v604_v43 = vadd.f32 %v3910_v31, %v603_v41  ;;  %v3941_v41 = vpop.permute.xlu1 %1343 }
  0xf2   : > { %v649_v45 = vmax.f32 %v612_v40, 0.0  ;;  %v714_v47 = vmul.f32 %v670_v11, %v648_v39 }
  0xf3   : > { %v647_v46 = vmax.f32 %v604_v43, 0.0  ;;  %v712_v49 = vmul.f32 %v660_v5, %v646_v42  ;;  %v3936_v5 = vpop.permute.xlu0 %932 }
  0xf4   : > { %v715_v48 = vmul.f32 %v675_v13, %v649_v45 }
  0xf5   : > { %v713_v50 = vmul.f32 %v665_v6, %v647_v46  ;;  %v3183_v52 = vpop.f32.mrb[4].mxu1 }
  0xf6   : > { %v3924_v53 = vpack.c.bf16 %v715_v48, %v714_v47  ;;  %v625_v54 = vadd.f32 %v3183_v52, %v3910_v31  ;;  %v616_v55 = vpop.f32.mrb[5].mxu1 }
  0xf7   : > { %v3927_v56 = vpack.c.bf16 %v713_v50, %v712_v49  ;;  %v617_v57 = vadd.f32 %v3910_v31, %v616_v55  ;;  %v3184_v58 = vpop.f32.mrb[6].mxu1  ;;  %v710_v49 = vpop.permute.xlu0 %709 }
  0xf8   : > { %v652_v60 = vmax.f32 %v625_v54, 0.0  ;;  %v628_v61 = vadd.f32 %v3184_v58, %v3910_v31  ;;  %v619_v62 = vpop.f32.mrb[7].mxu1  ;;  %v1411_v2 = vshll.u32 %v3924_v53, 16  ;;  %v1415_v54 = vshrl.u32 %v3924_v53, 16 }
  0xf9   : > { %v650_v63 = vmax.f32 %v617_v57, 0.0  ;;  %v620_v0 = vadd.f32 %v3910_v31, %v619_v62  ;;  %v1406_v1 = vshll.u32 %v3927_v56, 16  ;;  %v1404_v11 = vshrl.u32 %v3927_v56, 16 }
  0xfa   : > { %v653_v3 = vmax.f32 %v628_v61, 0.0  ;;  %v718_v33 = vmul.f32 %v3869_v8, %v652_v60  ;;  %v1413_v40 = vrot.slane %v1411_v2, 1  ;;  %v3546_v2 = vld [vmem:[%s4254_s4 + $0x8] sm:$0xff]  }
  0xfb   : > { %v651_v6 = vmax.f32 %v620_v0, 0.0  ;;  %v1408_v13 = vrot.slane %v1406_v1, 1  ;;  %v716_v35 = vmul.f32 %v3867_v7, %v650_v63  ;;  %v3956_v63 = vpop.permute.xlu1 %1353 }
  0xfc   : > { %v719_v34 = vmul.f32 %v695_v17, %v653_v3  ;;  %v1417_v60 = vor.u32 %v1415_v54, %v1413_v40 }
  0xfd   : > { %v717_v37 = vmul.f32 %v685_v15, %v651_v6  ;;  %v3187_v38 = vpop.f32.mrb[8].mxu1  ;;  %v1409_v39 = vor.u32 %v1408_v13, %v1404_v11 }
  0xfe   : > { %v3943_v42 = vpack.c.bf16 %v719_v34, %v718_v33  ;;  %v641_v43 = vadd.f32 %v3187_v38, %v3910_v31  ;;  %v632_v45 = vpop.f32.mrb[9].mxu1 }
  0xff   : > { %v3946_v46 = vpack.c.bf16 %v717_v37, %v716_v35  ;;  %v633_v8 = vadd.f32 %v3910_v31, %v632_v45  ;;  %v3188_v17 = vpop.f32.mrb[10].mxu1  ;;  %v1414_v47 = vsel %vm1402_vm1, %v1409_v39, %v1413_v40 }
 0x100   : > { %v656_v48 = vmax.f32 %v641_v43, 0.0  ;;  %v635_v7 = vpop.f32.mrb[11].mxu1  ;;  %3253 = vmatprep.mubr.msk.bf16.mxu0 %vm1451_vm2, %v1414_v47  ;;  %v1427_v15 = vshll.u32 %v3943_v42, 16 }
 0x101   : > { %v654_v50 = vmax.f32 %v633_v8, 0.0  ;;  %v636_v52 = vadd.f32 %v3910_v31, %v635_v7  ;;  %v1419_v55 = vshll.u32 %v3946_v46, 16  ;;  %v1423_v62 = vshrl.u32 %v3946_v46, 16  ;;  %v3547_v8 = vld [vmem:[%s4254_s4 + $0x30] sm:$0xff]   ;;  %v3985_v7 = vpop.permute.xlu1 %1363 }
 0x102   : > { %v722_v57 = vmul.f32 %v710_v49, %v656_v48  ;;  %v1429_v1 = vrot.slane %v1427_v15, 1  ;;  %v1431_v48 = vshrl.u32 %v3943_v42, 16 }
 0x103   : > { %v655_v58 = vmax.f32 %v636_v52, 0.0  ;;  %v1421_v61 = vrot.slane %v1419_v55, 1  ;;  %v720_v3 = vmul.f32 %v3871_v9, %v654_v50 }
 0x104   : > { %v728_v0 = vpack.c.bf16 %v722_v57, %v722_v57  ;;  %v1433_v52 = vor.u32 %v1431_v48, %v1429_v1  ;;  %v3548_v48 = vld [vmem:[%s4254_s4 + $0x38] sm:$0xff]  }
 0x105   : > { %v721_v6 = vmul.f32 %v3883_v19, %v655_v58  ;;  %v3199_v11 = vpop.f32.mrb[12].mxu1  ;;  %v3964_v13 = vsel %vm1402_vm1, %v1417_v60, %v1421_v61  ;;  %v1425_v33 = vor.u32 %v1423_v62, %v1421_v61 }
 0x106   : > { %v844_v34 = vadd.f32 %v3199_v11, %v3910_v31  ;;  %v835_v35 = vpop.f32.mrb[13].mxu1  ;;  %3254 = vmatmul.mubr.msk.bf16.vlgmr.msra.gmra.mrb[0].mxu0 %vm1451_vm2, %v3964_v13  ;;  %v2227_v19 = vshll.u32 %v728_v0, 16  ;;  %v4012_v11 = vpop.permute.xlu1 %1373 }
 0x107   : > { %v3969_v37 = vpack.c.bf16 %v721_v6, %v720_v3  ;;  %v836_v38 = vadd.f32 %v3910_v31, %v835_v35  ;;  %v3200_v39 = vpop.f32.mrb[14].mxu1  ;;  %v3973_v9 = vsel %vm1402_vm1, %v1425_v33, %v1429_v1  ;;  %3262 = vmatpush3.bf16.msra.mxu0 %v3864_v4 }
 0x108   : > { %v882_v40 = vmax.f32 %v844_v34, 0.0  ;;  %v847_v43 = vadd.f32 %v3200_v39, %v3910_v31  ;;  %v838_v45 = vpop.f32.mrb[15].mxu1  ;;  %3257 = vmatprep.mubr.msk.bf16.mxu0 %vm1451_vm2, %v3973_v9  ;;  %3263 = vmatprep.subr.bf16.mxu0 %v3546_v2  ;;  %v2229_v55 = vrot.slane %v2227_v19, 1 }
 0x109   : > { %v880_v17 = vmax.f32 %v836_v38, 0.0  ;;  %v839_v47 = vadd.f32 %v3910_v31, %v838_v45  ;;  %v1435_v4 = vshll.u32 %v3969_v37, 16  ;;  %v2223_v49 = vshrl.u32 %v3969_v37, 16 }
 0x10a   : > { %v883_v15 = vmax.f32 %v847_v43, 0.0  ;;  %v942_v57 = vmul.f32 %v3885_v20, %v882_v40  ;;  %v3561_v40 = vld [vmem:[%s4256_s6] sm:$0xff]  }
 0x10b   : > { %v881_v50 = vmax.f32 %v839_v47, 0.0  ;;  %v1437_v54 = vrot.slane %v1435_v4, 1  ;;  %3264 = vmatpush3.bf16.msra.mxu0 %v3546_v2  ;;  %v3991_v60 = vmul.f32 %v3881_v18, %v880_v17  ;;  %v3563_v43 = vld [vmem:[%s3747_s12 + $0x104] sm:$0xff]   ;;  %3357 = vmatprep.subr.bf16.mxu1 %v3561_v40 }
 0x10c   : > { %v943_v58 = vmul.f32 %v3912_v32, %v883_v15  ;;  %3273 = vmatprep.subr.bf16.mxu0 %v3547_v8  ;;  %3245 = vmatprep.mubr.msk.bf16.mxu1 %vm547_vm0, %v3563_v43 }
 0x10d   : > { %v3994_v61 = vmul.f32 %v3903_v29, %v881_v50  ;;  %v3203_v62 = vpop.f32.mrb[16].mxu1  ;;  %v3997_v0 = vsel %vm1402_vm1, %v1433_v52, %v1437_v54  ;;  %v2225_v3 = vor.u32 %v2223_v49, %v1437_v54  ;;  %3358 = vmatpush3.bf16.msra.mxu1 %v3561_v40  ;;  %v4031_v50 = vpop.permute.xlu1 %1163 }
 0x10e   : > { %v3999_v1 = vpack.c.bf16 %v943_v58, %v942_v57  ;;  %v860_v2 = vadd.f32 %v3203_v62, %v3910_v31  ;;  %v851_v6 = vpop.f32.mrb[17].mxu1  ;;  %3258 = vmatmul.mubr.msk.bf16.gmra.mrb[4].mxu0 %vm1451_vm2, %v3997_v0 }
 0x10f   : > { %v950_v18 = vpack.c.bf16 %v3994_v61, %v3991_v60  ;;  %v852_v20 = vadd.f32 %v3910_v31, %v851_v6  ;;  %v3204_v29 = vpop.f32.mrb[18].mxu1  ;;  %3265 = vmatprep.mubr.msk.bf16.mxu0 %vm1451_vm2, %v3927_v56  ;;  %v4010_v32 = vsel %vm1402_vm1, %v2225_v3, %v2229_v55  ;;  %v3562_v56 = vld [vmem:[%s4256_s6 + $0x8] sm:$0xff]  }
 0x110   : > { %v886_v33 = vmax.f32 %v860_v2, 0.0  ;;  %v863_v34 = vadd.f32 %v3204_v29, %v3910_v31  ;;  %v854_v35 = vpop.f32.mrb[19].mxu1  ;;  %3359 = vmatprep.subr.bf16.mxu1 %v3562_v56 }
 0x111   : > { %v884_v38 = vmax.f32 %v852_v20, 0.0  ;;  %v855_v39 = vadd.f32 %v3910_v31, %v854_v35  ;;  %3360 = vmatpush3.bf16.msra.mxu1 %v3562_v56  ;;  %v938_v3 = vpop.permute.xlu1 %937 }
 0x112   : > { %v887_v19 = vmax.f32 %v863_v34, 0.0  ;;  %v946_v17 = vmul.f32 %v3893_v24, %v886_v33 }
 0x113   : > { %v885_v45 = vmax.f32 %v855_v39, 0.0  ;;  %v944_v4 = vmul.f32 %v3889_v22, %v884_v38 }
 0x114   : > { %v947_v47 = vmul.f32 %v3930_v59, %v887_v19 }
 0x115   : > { %v945_v15 = vmul.f32 %v3920_v44, %v885_v45  ;;  %v3207_v49 = vpop.f32.mrb[20].mxu1  ;;  %v3549_v44 = vld [vmem:[%s4254_s4 + $0x10] sm:$0xff]  }
 0x116   : > { %v4033_v52 = vpack.c.bf16 %v947_v47, %v946_v17  ;;  %v867_v24 = vpop.f32.mrb[21].mxu1  ;;  %3266 = vmatmul.mubr.msk.bf16.vlgmr.msra.gmra.mrb[0].mxu0 %vm1451_vm2, %v3924_v53 }
 0x117   : > { %v4037_v59 = vpack.c.bf16 %v945_v15, %v944_v4  ;;  %v868_v54 = vadd.f32 %v3910_v31, %v867_v24  ;;  %v3208_v55 = vpop.f32.mrb[22].mxu1  ;;  %3269 = vmatprep.mubr.msk.bf16.mxu0 %vm1451_vm2, %v3946_v46  ;;  %3274 = vmatpush3.bf16.msra.mxu0 %v3547_v8 }
 0x118   : > { %v870_v22 = vpop.f32.mrb[23].mxu1  ;;  %3275 = vmatprep.subr.bf16.mxu0 %v3548_v48 }
 0x119   : > { %v888_v57 = vmax.f32 %v868_v54, 0.0  ;;  %v871_v58 = vadd.f32 %v3910_v31, %v870_v22 }
 0x11b   : > { %v889_v62 = vmax.f32 %v871_v58, 0.0  ;;  %3276 = vmatpush3.bf16.msra.mxu0 %v3548_v48  ;;  %v4047_v2 = vmul.f32 %v3936_v5, %v888_v57 }
 0x11c   : > { %3285 = vmatprep.subr.bf16.mxu0 %v3549_v44 }
 0x11d   : > { %v4049_v6 = vmul.f32 %v938_v3, %v889_v62  ;;  %v3219_v8 = vpop.f32.mrb[24].mxu1 }
 0x11e   : > { %v1070_v20 = vadd.f32 %v3219_v8, %v3910_v31  ;;  %v1061_v29 = vpop.f32.mrb[25].mxu1  ;;  %3270 = vmatmul.mubr.msk.bf16.gmra.mrb[4].mxu0 %vm1451_vm2, %v3943_v42 }
 0x11f   : > { %v954_v33 = vpack.c.bf16 %v4049_v6, %v4047_v2  ;;  %v1062_v34 = vadd.f32 %v3910_v31, %v1061_v29  ;;  %v3220_v35 = vpop.f32.mrb[26].mxu1 }
 0x120   : > { %v1108_v38 = vmax.f32 %v1070_v20, 0.0  ;;  %v1073_v39 = vadd.f32 %v3220_v35, %v3910_v31  ;;  %v1064_v5 = vpop.f32.mrb[27].mxu1 }
 0x121   : > { %v1106_v19 = vmax.f32 %v1062_v34, 0.0  ;;  %v1065_v40 = vadd.f32 %v3910_v31, %v1064_v5 }
 0x122   : > { %v1109_v56 = vmax.f32 %v1073_v39, 0.0  ;;  %v1168_v45 = vmul.f32 %v3875_v12, %v1108_v38  ;;  %v3550_v12 = vld [vmem:[%s4254_s4 + $0x18] sm:$0xff]   ;;  %v3551_v39 = vld [vmem:[%s4254_s4 + $0x40] sm:$0xff]  }
 0x123   : > { %v1107_v43 = vmax.f32 %v1065_v40, 0.0  ;;  %v1166_v47 = vmul.f32 %v3873_v10, %v1106_v19 }
 0x124   : > { %v1169_v17 = vmul.f32 %v3891_v23, %v1109_v56 }
 0x125   : > { %v1167_v48 = vmul.f32 %v3887_v21, %v1107_v43  ;;  %v3223_v4 = vpop.f32.mrb[28].mxu1 }
 0x126   : > { %v1177_v15 = vpack.c.bf16 %v1169_v17, %v1168_v45  ;;  %v1086_v49 = vadd.f32 %v3223_v4, %v3910_v31  ;;  %v1077_v24 = vpop.f32.mrb[29].mxu1 }
 0x127   : > { %v1176_v54 = vpack.c.bf16 %v1167_v48, %v1166_v47  ;;  %v1078_v55 = vadd.f32 %v3910_v31, %v1077_v24  ;;  %v3224_v22 = vpop.f32.mrb[30].mxu1 }
 0x128   : > { %v1112_v57 = vmax.f32 %v1086_v49, 0.0  ;;  %v1089_v58 = vadd.f32 %v3224_v22, %v3910_v31  ;;  %v1080_v62 = vpop.f32.mrb[31].mxu1  ;;  %v1910_v3 = vshll.u32 %v1177_v15, 16  ;;  %v1914_v49 = vshrl.u32 %v1177_v15, 16 }
 0x129   : > { %v1906_v10 = vshll.u32 %v1176_v54, 16  ;;  %v1110_v23 = vmax.f32 %v1078_v55, 0.0  ;;  %v1081_v21 = vadd.f32 %v3910_v31, %v1080_v62  ;;  %3277 = vmatprep.mubr.msk.bf16.mxu0 %vm1451_vm2, %v1176_v54  ;;  %v1904_v20 = vshrl.u32 %v1176_v54, 16 }
 0x12a   : > { %v1113_v8 = vmax.f32 %v1089_v58, 0.0  ;;  %3278 = vmatmul.mubr.msk.bf16.vlgmr.msra.gmra.mrb[0].mxu0 %vm1451_vm2, %v1177_v15  ;;  %v1172_v35 = vmul.f32 %v3879_v16, %v1112_v57  ;;  %v1912_v43 = vrot.slane %v1910_v3, 1 }
 0x12b   : > { %v1111_v29 = vmax.f32 %v1081_v21, 0.0  ;;  %3286 = vmatpush3.bf16.msra.mxu0 %v3549_v44  ;;  %v1908_v34 = vrot.slane %v1906_v10, 1  ;;  %v1170_v5 = vmul.f32 %v3877_v14, %v1110_v23 }
 0x12c   : > { %v1173_v38 = vmul.f32 %v3899_v27, %v1113_v8  ;;  %3287 = vmatprep.subr.bf16.mxu0 %v3550_v12  ;;  %v1916_v57 = vor.u32 %v1914_v49, %v1912_v43 }
 0x12d   : > { %v1171_v19 = vmul.f32 %v3895_v25, %v1111_v29  ;;  %v3227_v40 = vpop.f32.mrb[32].mxu1  ;;  %v1909_v56 = vor.u32 %v1908_v34, %v1904_v20 }
 0x12e   : > { %v1179_v45 = vpack.c.bf16 %v1173_v38, %v1172_v35  ;;  %v1093_v17 = vpop.f32.mrb[33].mxu1 }
 0x12f   : > { %v1178_v44 = vpack.c.bf16 %v1171_v19, %v1170_v5  ;;  %v1094_v47 = vadd.f32 %v3910_v31, %v1093_v17  ;;  %v3228_v16 = vpop.f32.mrb[34].mxu1  ;;  %3288 = vmatpush3.bf16.msra.mxu0 %v3550_v12  ;;  %v4081_v27 = vsel %vm1402_vm1, %v1909_v56, %v1912_v43 }
 0x130   : > { %v1096_v48 = vpop.f32.mrb[35].mxu1  ;;  %3297 = vmatprep.subr.bf16.mxu0 %v3551_v39  ;;  %v1924_v4 = vshll.u32 %v1179_v45, 16  ;;  %v1928_v34 = vshrl.u32 %v1179_v45, 16 }
 0x131   : > { %v1917_v14 = vshll.u32 %v1178_v44, 16  ;;  %v1114_v24 = vmax.f32 %v1094_v47, 0.0  ;;  %v1097_v25 = vadd.f32 %v3910_v31, %v1096_v48  ;;  %3281 = vmatprep.mubr.msk.bf16.mxu0 %vm1451_vm2, %v1178_v44  ;;  %v1921_v55 = vshrl.u32 %v1178_v44, 16 }
 0x132   : > { %3282 = vmatmul.mubr.msk.bf16.gmra.mrb[4].mxu0 %vm1451_vm2, %v1179_v45  ;;  %v1926_v58 = vrot.slane %v1924_v4, 1  ;;  %v3553_v45 = vld [vmem:[%s4254_s4 + $0x50] sm:$0xff]  }
 0x133   : > { %v1919_v54 = vrot.slane %v1917_v14, 1  ;;  %v1115_v22 = vmax.f32 %v1097_v25, 0.0  ;;  %3289 = vmatprep.mubr.msk.bf16.mxu0 %vm1451_vm2, %v950_v18  ;;  %v1174_v15 = vmul.f32 %v3922_v51, %v1114_v24 }
 0x134   : > { %v1930_v43 = vor.u32 %v1928_v34, %v1926_v58 }
 0x135   : > { %v1175_v62 = vmul.f32 %v4031_v50, %v1115_v22  ;;  %v3239_v12 = vpop.f32.mrb[36].mxu1  ;;  %v4093_v10 = vsel %vm1402_vm1, %v1916_v57, %v1919_v54  ;;  %v1923_v23 = vor.u32 %v1921_v55, %v1919_v54  ;;  %v3552_v50 = vld [vmem:[%s4254_s4 + $0x48] sm:$0xff]  }
 0x136   : > { %v1294_v21 = vadd.f32 %v3239_v12, %v3910_v31  ;;  %v1285_v3 = vpop.f32.mrb[37].mxu1 }
 0x137   : > { %v1180_v8 = vpack.c.bf16 %v1175_v62, %v1174_v15  ;;  %v1286_v20 = vadd.f32 %v3910_v31, %v1285_v3  ;;  %v3240_v60 = vpop.f32.mrb[38].mxu1  ;;  %v1927_v61 = vsel %vm1402_vm1, %v1923_v23, %v1926_v58 }
 0x138   : > { %v1330_v18 = vmax.f32 %v1294_v21, 0.0  ;;  %v1297_v29 = vadd.f32 %v3240_v60, %v3910_v31  ;;  %v1288_v51 = vpop.f32.mrb[39].mxu1 }
 0x139   : > { %v1932_v35 = vshll.u32 %v1180_v8, 16  ;;  %v1328_v38 = vmax.f32 %v1286_v20, 0.0  ;;  %v1289_v5 = vadd.f32 %v3910_v31, %v1288_v51 }
 0x13a   : > { %v1331_v19 = vmax.f32 %v1297_v29, 0.0  ;;  %3290 = vmatmul.mubr.msk.bf16.vlgmr.msra.gmra.mrb[0].mxu0 %vm1451_vm2, %v3999_v1  ;;  %v1378_v17 = vmul.f32 %v3901_v28, %v1330_v18  ;;  %v3566_v29 = vld [vmem:[%s4259_s9 + $0x8] sm:$0xff]  }
 0x13b   : > { %v1934_v40 = vrot.slane %v1932_v35, 1  ;;  %v1329_v56 = vmax.f32 %v1289_v5, 0.0  ;;  %3293 = vmatprep.mubr.msk.bf16.mxu0 %vm1451_vm2, %v4037_v59  ;;  %3298 = vmatpush3.bf16.msra.mxu0 %v3551_v39  ;;  %v1376_v47 = vmul.f32 %v3897_v26, %v1328_v38 }
 0x13c   : > { %v1379_v44 = vmul.f32 %v3956_v63, %v1331_v19  ;;  %3299 = vmatprep.subr.bf16.mxu0 %v3552_v50 }
 0x13d   : > { %v1377_v16 = vmul.f32 %v3941_v41, %v1329_v56  ;;  %v3243_v48 = vpop.f32.mrb[40].mxu1  ;;  %v1935_v4 = vsel %vm1402_vm1, %v1930_v43, %v1934_v40  ;;  %v3567_v40 = vld [vmem:[%s4259_s9 + $0x10] sm:$0xff]  }
 0x13e   : > { %v1385_v49 = vpack.c.bf16 %v1379_v44, %v1378_v17  ;;  %v1310_v39 = vadd.f32 %v3243_v48, %v3910_v31  ;;  %v1301_v14 = vpop.f32.mrb[41].mxu1  ;;  %v3571_v48 = vld [vmem:[%s4198_s25 + $0x10] sm:$0xff]  }
 0x13f   : > { %v1384_v24 = vpack.c.bf16 %v1377_v16, %v1376_v47  ;;  %v1302_v28 = vadd.f32 %v3910_v31, %v1301_v14  ;;  %v3244_v63 = vpop.f32.mrb[42].mxu1  ;;  %3300 = vmatpush3.bf16.msra.mxu0 %v3552_v50  ;;  %v3568_v47 = vld [vmem:[%s4259_s9 + $0x18] sm:$0xff]   ;;  %v3570_v16 = vld [vmem:[%s4198_s25 + $0x8] sm:$0xff]  }
 0x140   : > { %v1334_v25 = vmax.f32 %v1310_v39, 0.0  ;;  %v1313_v54 = vadd.f32 %v3244_v63, %v3910_v31  ;;  %v1304_v55 = vpop.f32.mrb[43].mxu1  ;;  %3309 = vmatprep.subr.bf16.mxu0 %v3553_v45  ;;  %v3007_v63 = vld [vmem:[%s4260_s10] ss:$0 sm:$0xff] }
 0x141   : > { %v1332_v26 = vmax.f32 %v1302_v28, 0.0  ;;  %v1305_v41 = vadd.f32 %v3910_v31, %v1304_v55  ;;  %v3554_v31 = vld [vmem:[%s4254_s4 + $0x58] sm:$0xff]   ;;  %v3000_v28 = vld [vmem:[%s4257_s7] ss:$0 sm:$0xff] }
 0x142   : > { %v1335_v22 = vmax.f32 %v1313_v54, 0.0  ;;  %3294 = vmatmul.mubr.msk.bf16.gmra.mrb[4].mxu0 %vm1451_vm2, %v4033_v52  ;;  %v1382_v58 = vmul.f32 %v3915_v36, %v1334_v25  ;;  %v3555_v36 = vld [vmem:[%s4254_s4 + $0x60] sm:$0xff]   ;;  %v3391_v25 = vadd.f32 %v3007_v63, %v3000_v28 }
 0x143   : > { %v1333_v57 = vmax.f32 %v1305_v41, 0.0  ;;  %3301 = vmatprep.mubr.msk.bf16.mxu0 %vm1451_vm2, %v1384_v24  ;;  %v1380_v62 = vmul.f32 %v3905_v30, %v1332_v26  ;;  %v3556_v30 = vld [vmem:[%s4254_s4 + $0x68] sm:$0xff]  }
 0x144   : > { %v1383_v15 = vmul.f32 %v4012_v11, %v1335_v22  ;;  %v3558_v11 = vld [vmem:[%s4254_s4 + $0x78] sm:$0xff]  }
 0x145   : > { %v1381_v12 = vmul.f32 %v3985_v7, %v1333_v57  ;;  %v3557_v7 = vld [vmem:[%s4254_s4 + $0x70] sm:$0xff]  }
 0x146   : > { %v1387_v23 = vpack.c.bf16 %v1383_v15, %v1382_v58 }
 0x147   : > { %v1386_v21 = vpack.c.bf16 %v1381_v12, %v1380_v62 }
 0x14a   : > { %3302 = vmatmul.mubr.msk.bf16.vlgmr.msra.gmra.mrb[0].mxu0 %vm1451_vm2, %v1385_v49 }
 0x14b   : > { %3305 = vmatprep.mubr.msk.bf16.mxu0 %vm1451_vm2, %v1386_v21  ;;  %3310 = vmatpush3.bf16.msra.mxu0 %v3553_v45  ;;  %v3569_v45 = vld [vmem:[%s4198_s25] sm:$0xff]  }
 0x14c   : > { %3311 = vmatprep.subr.bf16.mxu0 %v3554_v31 }
 0x14f   : > { %3312 = vmatpush3.bf16.msra.mxu0 %v3554_v31 }
 0x150   : > { %3321 = vmatprep.subr.bf16.mxu0 %v3555_v36 }
 0x152   : > { %3306 = vmatmul.mubr.msk.bf16.gmra.mrb[4].mxu0 %vm1451_vm2, %v1387_v23 }
 0x153   : > { %3313 = vmatprep.mubr.msk.bf16.mxu0 %vm1451_vm2, %v4081_v27  ;;  %v3559_v27 = vld [vmem:[%s4254_s4 + $0x80] sm:$0xff]  }
 0x15a   : > { %3314 = vmatmul.mubr.msk.bf16.vlgmr.msra.gmra.mrb[0].mxu0 %vm1451_vm2, %v4093_v10 }
 0x15b   : > { %3317 = vmatprep.mubr.msk.bf16.mxu0 %vm1451_vm2, %v1927_v61  ;;  %3322 = vmatpush3.bf16.msra.mxu0 %v3555_v36 }
 0x15c   : > { %3323 = vmatprep.subr.bf16.mxu0 %v3556_v30 }
 0x15f   : > { %3324 = vmatpush3.bf16.msra.mxu0 %v3556_v30 }
 0x160   : > { %3333 = vmatprep.subr.bf16.mxu0 %v3557_v7 }
 0x162   : > { %3318 = vmatmul.mubr.msk.bf16.gmra.mrb[4].mxu0 %vm1451_vm2, %v1935_v4  ;;  %v3572_v4 = vld [vmem:[%s4198_s25 + $0x18] sm:$0xff]  }
 0x163   : > { %3325 = vmatprep.mubr.msk.bf16.mxu0 %vm1451_vm2, %v3924_v53  ;;  %v3560_v53 = vld [vmem:[%s4254_s4 + $0x88] sm:$0xff]  }
 0x16a   : > { %3326 = vmatmul.mubr.msk.bf16.vlgmr.msra.gmra.mrb[0].mxu0 %vm1451_vm2, %v3946_v46  ;;  %v3565_v46 = vld [vmem:[%s4259_s9] sm:$0xff]  }
 0x16b   : > { %3329 = vmatprep.mubr.msk.bf16.mxu0 %vm1451_vm2, %v3943_v42  ;;  %3334 = vmatpush3.bf16.msra.mxu0 %v3557_v7  ;;  %v3564_v42 = vld [vmem:[%s3747_s12 + $0x10c] ss:$0 sps:$4 sm:$0xff]  }
 0x16c   : > { %3335 = vmatprep.subr.bf16.mxu0 %v3558_v11  ;;  %3246 = vmatmul.mubr.msk.bf16.gmra.mrb[44].mxu1 %vm547_vm0, %v3564_v42 }
 0x16d   : > { %3369 = vmatprep.subr.bf16.mxu1 %v3565_v46 }
 0x16f   : > { %3336 = vmatpush3.bf16.msra.mxu0 %v3558_v11 }
 0x170   : > { %3345 = vmatprep.subr.bf16.mxu0 %v3559_v27 }
 0x172   : > { %3330 = vmatmul.mubr.msk.bf16.gmra.mrb[4].mxu0 %vm1451_vm2, %v3969_v37 }
 0x173   : > { %3337 = vmatprep.mubr.msk.bf16.mxu0 %vm1451_vm2, %v3999_v1 }
 0x17a   : > { %3338 = vmatmul.mubr.msk.bf16.vlgmr.msra.gmra.mrb[0].mxu0 %vm1451_vm2, %v4037_v59 }
 0x17b   : > { %3341 = vmatprep.mubr.msk.bf16.mxu0 %vm1451_vm2, %v4033_v52  ;;  %3346 = vmatpush3.bf16.msra.mxu0 %v3559_v27 }
 0x17c   : > { %3347 = vmatprep.subr.bf16.mxu0 %v3560_v53 }
 0x17f   : > { %3348 = vmatpush3.bf16.msra.mxu0 %v3560_v53 }
 0x182   : > { %3342 = vmatmul.mubr.msk.bf16.gmra.mrb[4].mxu0 %vm1451_vm2, %v954_v33 }
 0x183   : > { %3349 = vmatprep.mubr.msk.bf16.mxu0 %vm1451_vm2, %v3964_v13  ;;  %v2999_v13 = vld [vmem:[%s4255_s5] ss:$0 sm:$0xff] }
 0x18a   : > { %3350 = vmatmul.mubr.msk.bf16.vlgmr.msra.gmra.mrb[0].mxu0 %vm1451_vm2, %v3973_v9 }
 0x18b   : > { %3353 = vmatprep.mubr.msk.bf16.mxu0 %vm1451_vm2, %v3997_v0 }
 0x192   : > { %3354 = vmatmul.mubr.msk.bf16.gmra.mrb[4].mxu0 %vm1451_vm2, %v4010_v32 }
 0x23f   : > { %v3247_v49 = vpop.f32.mrb[44].mxu1 }
 0x240   : > { %v1317_v39 = vpop.f32.mrb[45].mxu1 }
 0x241   : > { %v3248_v14 = vpop.f32.mrb[46].mxu1 }
 0x242   : > { %v1319_v24 = vpop.f32.mrb[47].mxu1 }
 0x25d   : > { %v3351_v37 = vpop.f32.mrb[0].mxu0 }
 0x25e   : > { %v2336_v9 = vadd.f32 %v3351_v37, %v2999_v13  ;;  %v2280_v0 = vpop.f32.mrb[1].mxu0 }
 0x25f   : > { %v2334_v1 = vadd.f32 %v2999_v13, %v2280_v0  ;;  %v3352_v32 = vpop.f32.mrb[2].mxu0 }
 0x260   : > { %v2337_v52 = vadd.f32 %v3352_v32, %v2999_v13  ;;  %v2283_v59 = vpop.f32.mrb[3].mxu0  ;;  %v2344_v6 = vmax.f32 %v2336_v9, 0.0 }
 0x261   : > { %v2335_v2 = vadd.f32 %v2999_v13, %v2283_v59  ;;  %v2342_v10 = vmax.f32 %v2334_v1, 0.0 }
 0x262   : > { %v2345_v33 = vmax.f32 %v2337_v52, 0.0 }
 0x263   : > { %v2343_v3 = vmax.f32 %v2335_v2, 0.0 }
 0x264   : > { %v2351_v8 = vpack.c.bf16 %v2345_v33, %v2344_v6 }
 0x265   : > { %v2350_v20 = vpack.c.bf16 %v2343_v3, %v2342_v10  ;;  %v3355_v60 = vpop.f32.mrb[4].mxu0 }
 0x266   : > { %v2340_v61 = vadd.f32 %v3355_v60, %v2999_v13  ;;  %v2296_v18 = vpop.f32.mrb[5].mxu0 }
 0x267   : > { %v2338_v51 = vadd.f32 %v2999_v13, %v2296_v18  ;;  %v3356_v50 = vpop.f32.mrb[6].mxu0  ;;  %3361 = vmatprep.mubr.msk.bf16.mxu1 %vm1451_vm2, %v2350_v20 }
 0x268   : > { %v2341_v34 = vadd.f32 %v3356_v50, %v2999_v13  ;;  %v2299_v35 = vpop.f32.mrb[7].mxu0  ;;  %3362 = vmatmul.mubr.msk.bf16.vlgmr.msra.gmra.mrb[48].mxu1 %vm1451_vm2, %v2351_v8  ;;  %v2348_v5 = vmax.f32 %v2340_v61, 0.0 }
 0x269   : > { %v2339_v38 = vadd.f32 %v2999_v13, %v2299_v35  ;;  %3370 = vmatpush3.bf16.msra.mxu1 %v3565_v46  ;;  %v2346_v56 = vmax.f32 %v2338_v51, 0.0 }
 0x26a   : > { %v2349_v19 = vmax.f32 %v2341_v34, 0.0  ;;  %3371 = vmatprep.subr.bf16.mxu1 %v3566_v29 }
 0x26b   : > { %v2347_v43 = vmax.f32 %v2339_v38, 0.0 }
 0x26c   : > { %v2353_v17 = vpack.c.bf16 %v2349_v19, %v2348_v5 }
 0x26d   : > { %v2352_v44 = vpack.c.bf16 %v2347_v43, %v2346_v56  ;;  %3372 = vmatpush3.bf16.msra.mxu1 %v3566_v29 }
 0x26e   : > { %3373 = vmatprep.subr.bf16.mxu1 %v3567_v40 }
 0x26f   : > { %3365 = vmatprep.mubr.msk.bf16.mxu1 %vm1451_vm2, %v2352_v44 }
 0x270   : > { %3366 = vmatmul.mubr.msk.bf16.gmra.mrb[52].mxu1 %vm1451_vm2, %v2353_v17 }
 0x271   : > { %3374 = vmatpush3.bf16.msra.mxu1 %v3567_v40  ;;  %3377 = vmatprep.mubr.msk.bf16.mxu1 %vm547_vm0, %v3569_v45 }
 0x272   : > { %3375 = vmatprep.subr.bf16.mxu1 %v3568_v47 }
 0x275   : > { %3376 = vmatpush3.bf16.msra.mxu1 %v3568_v47 }
 0x278   : > { %3378 = vmatmul.mubr.msk.bf16.vlgmr.msra.gmra.mrb[48].mxu1 %vm547_vm0, %v3570_v16 }
 0x279   : > { %3381 = vmatprep.mubr.msk.bf16.mxu1 %vm547_vm0, %v3571_v48 }
 0x280   : > { %3382 = vmatmul.mubr.msk.bf16.gmra.mrb[52].mxu1 %vm547_vm0, %v3572_v4 }
 0x34b   : > { %v3379_v54 = vpop.f32.mrb[48].mxu1 }
 0x34c   : > { %v3385_v55 = vadd.f32 %v3379_v54, %v3000_v28  ;;  %v2567_v26 = vpop.f32.mrb[49].mxu1 }
 0x34d   : > { %v3387_v41 = vadd.f32 %v3000_v28, %v2567_v26  ;;  %v3380_v22 = vpop.f32.mrb[50].mxu1 }
 0x34e   : > { %v3386_v57 = vadd.f32 %v3385_v55, %v3007_v63  ;;  %v3390_v58 = vadd.f32 %v3391_v25, %v3380_v22  ;;  %v2570_v15 = vpop.f32.mrb[51].mxu1 }
 0x34f   : > { %v3388_v62 = vadd.f32 %v3387_v41, %v3007_v63  ;;  %v3392_v12 = vadd.f32 %v3391_v25, %v2570_v15 }
 0x350   : > { %v2608_v23 = vmax.f32 %v3386_v57, 0.0  ;;  %v2609_v21 = vmax.f32 %v3390_v58, 0.0 }
 0x351   : > { %v2606_v31 = vmax.f32 %v3388_v62, 0.0  ;;  %v2607_v36 = vmax.f32 %v3392_v12, 0.0 }
 0x352   : > { %v3046_v30 = vpack.c.bf16 %v2609_v21, %v2608_v23 }
 0x353   : > { %v3041_v7 = vpack.c.bf16 %v2607_v36, %v2606_v31  ;;  %v3383_v11 = vpop.f32.mrb[52].mxu1 }
 0x354   : > { %3058 = vst [vmem:[%s449_s17 + $0x8] sm:$0xff] %v3046_v30   ;;  %v3394_v27 = vadd.f32 %v3391_v25, %v3383_v11  ;;  %v2583_v53 = vpop.f32.mrb[53].mxu1 }
 0x355   : > { %3042 = vst [vmem:[%s449_s17] sm:$0xff] %v3041_v7   ;;  %v3396_v42 = vadd.f32 %v3391_v25, %v2583_v53  ;;  %v3384_v46 = vpop.f32.mrb[54].mxu1 }
 0x356   : > { %v3398_v13 = vadd.f32 %v3391_v25, %v3384_v46  ;;  %v2586_v37 = vpop.f32.mrb[55].mxu1  ;;  %v2612_v0 = vmax.f32 %v3394_v27, 0.0 }
 0x357   : > { %v3400_v9 = vadd.f32 %v3391_v25, %v2586_v37  ;;  %v2610_v32 = vmax.f32 %v3396_v42, 0.0 }
 0x358   : > { %v2613_v1 = vmax.f32 %v3398_v13, 0.0 }
 0x359   : > { %v2611_v52 = vmax.f32 %v3400_v9, 0.0 }
 0x35a   : > { %v3056_v59 = vpack.c.bf16 %v2613_v1, %v2612_v0 }
 0x35b   : > { %v3051_v2 = vpack.c.bf16 %v2611_v52, %v2610_v32 }
 0x35c   : > { %3060 = vst [vmem:[%s449_s17 + $0x18] sm:$0xff] %v3056_v59  }
 0x35d   : > { %3059 = vst [vmem:[%s449_s17 + $0x10] sm:$0xff] %v3051_v2  }
 0x35e PF: > { %s21_s21 = sadd.s32 1, %s3611_s21   ;;  %s4262_s17 = smov %s3603_s19 }
 0x35f   : > { %p18_p8 = scmp.ge.s32.totalorder %s21_s21, 6   ;;  %s4263_s18 = smov %s3607_s20 }
 0x360   : > { %s4264_s19 = smov %s4267_s22  ;;  %s4265_s20 = smov %s4271_s23 }
 0x361   :  { %20 = sbr.rel (!%p18_p8) target bundleno = 3 (0x3), region = 113 }

</bundles_post_ra>
